<compile_context>
chip_gen: v5e
topology: v5e:2x2
jax: 0.10.0
libtpu: 0.0.40
codegen_flags: <defaults>
</compile_context>

<pallas_src>
import jax
import jax.numpy as jnp
from jax.experimental import pallas as pl
from jax.experimental.pallas import tpu as pltpu

_LN_EPS = 1e-5


def _ffn_block_kernel(x_ref, g_ref, be_ref, w1_ref, b1_ref, w2_ref, b2_ref, o_ref):
    # --- pre-norm LayerNorm (f32; XLU lane reductions, EUP rsqrt) ---
    x32 = x_ref[...].astype(jnp.float32)
    mu = jnp.mean(x32, axis=-1, keepdims=True)
    xc = x32 - mu
    var = jnp.mean(xc * xc, axis=-1, keepdims=True)
    inv = jax.lax.rsqrt(var + _LN_EPS)
    xn = xc * inv * g_ref[...].astype(jnp.float32) + be_ref[...].astype(jnp.float32)

    # --- Linear1: (tm, H) @ (H, F) on the MXU, bf16 operands, f32 accumulation ---
    h = jnp.dot(xn.astype(jnp.bfloat16), w1_ref[...],
                preferred_element_type=jnp.float32)
    h = h + b1_ref[...].astype(jnp.float32)

    # --- SiLU with a single EUP op: sigmoid(h) = 0.5*tanh(0.5*h) + 0.5 ---
    s = 0.5 * jnp.tanh(0.5 * h) + 0.5
    h = h * s

    # --- Linear2: (tm, F) @ (F, H), bf16 operands, f32 accumulation ---
    y = jnp.dot(h.astype(jnp.bfloat16), w2_ref[...],
                preferred_element_type=jnp.float32)
    y = y + b2_ref[...].astype(jnp.float32)

    # --- residual + writeback (bf16 out) ---
    o_ref[...] = (x32 + y).astype(o_ref.dtype)


def ffn_block_forward(x, gamma, beta, w1, b1, w2, b2, *, tm=256,
                      out_dtype=jnp.bfloat16):
    """x: (rows, H). w1: (H, F), w2: (F, H) stored (in, out). Returns (rows, H)."""
    rows, H = x.shape
    F = w1.shape[1]

    # bf16 activations / weights at the call boundary (upstream layers would
    # normally already produce bf16). LN/bias params stay f32.
    x_bf = x.astype(jnp.bfloat16)
    w1_bf = w1.astype(jnp.bfloat16)
    w2_bf = w2.astype(jnp.bfloat16)

    grid_m = pl.cdiv(rows, tm)   # ragged last tile handled by Pallas write masking

    out_itemsize = jnp.dtype(out_dtype).itemsize
    # Resident weights + double-buffered activation tiles + in-kernel intermediates.
    data_bytes = 2 * (tm * H * 2 + tm * H * out_itemsize) \
        + 2 * (H * F + F * H) * 2 + 2 * (F + 3 * H) * 4
    scratch_bytes = 4 * tm * F * 4 + 4 * tm * H * 4
    vmem_limit = min(max(data_bytes + scratch_bytes + (8 << 20), 32 << 20), 64 << 20)

    cost = pl.CostEstimate(
        flops=4 * rows * H * F + 12 * rows * H + 4 * rows * F,
        transcendentals=rows * (F + 1),                    # tanh per FFN elem + rsqrt
        bytes_accessed=2 * rows * H * 2 + 2 * H * F * 2 + (F + 3 * H) * 4,
    )

    return pl.pallas_call(
        _ffn_block_kernel,
        out_shape=jax.ShapeDtypeStruct((rows, H), out_dtype),
        grid_spec=pltpu.PrefetchScalarGridSpec(
            num_scalar_prefetch=0,
            grid=(grid_m,),
            in_specs=[
                pl.BlockSpec((tm, H), lambda i: (i, 0)),   # x tile, pipelined over rows
                pl.BlockSpec((1, H), lambda i: (0, 0)),    # LN gamma (resident)
                pl.BlockSpec((1, H), lambda i: (0, 0)),    # LN beta  (resident)
                pl.BlockSpec((H, F), lambda i: (0, 0)),    # W1 (resident in VMEM)
                pl.BlockSpec((1, F), lambda i: (0, 0)),    # b1
                pl.BlockSpec((F, H), lambda i: (0, 0)),    # W2 (resident in VMEM)
                pl.BlockSpec((1, H), lambda i: (0, 0)),    # b2
            ],
            out_specs=pl.BlockSpec((tm, H), lambda i: (i, 0)),
        ),
        compiler_params=pltpu.CompilerParams(
            dimension_semantics=("parallel",),             # rows independent; megacore
            vmem_limit_bytes=vmem_limit,
        ),
        cost_estimate=cost,
    )(x_bf, gamma, beta, w1_bf, b1, w2_bf, b2)


def _reference(x, gamma, beta, w1, b1, w2, b2):
    mu = x.mean(-1, keepdims=True)
    var = ((x - mu) ** 2).mean(-1, keepdims=True)
    xn = (x - mu) / jnp.sqrt(var + _LN_EPS) * gamma + beta
    h = xn @ w1 + b1
    h = h * jax.nn.sigmoid(h)
    return x + (h @ w2 + b2)


if __name__ == "__main__":
    # Deterministic synthetic parameters / inputs (no checkpoint loading).
    hidden_dim = 128
    ffn_factor = 2.0
    ffn_dim = int(ffn_factor * hidden_dim)                 # 256
    batch, n_tokens = 80, 9                                # cont + cat features + CLS
    rows = batch * n_tokens                                # 720 -> grid of 3 @ tm=256,
                                                           # ragged last tile (masked)

    key = jax.random.PRNGKey(0)
    kx, kw1, kb1, kw2, kb2 = jax.random.split(key, 5)

    x = jax.random.normal(kx, (rows, hidden_dim), dtype=jnp.float32)
    gamma = jnp.ones((1, hidden_dim), jnp.float32)         # nn.LayerNorm init
    beta = jnp.zeros((1, hidden_dim), jnp.float32)

    bound1 = 1.0 / (hidden_dim ** 0.5)
    w1 = jax.random.uniform(kw1, (hidden_dim, ffn_dim),
                            minval=-bound1, maxval=bound1, dtype=jnp.float32)
    b1 = jax.random.uniform(kb1, (1, ffn_dim),
                            minval=-bound1, maxval=bound1, dtype=jnp.float32)
    bound2 = 1.0 / (ffn_dim ** 0.5)
    w2 = jax.random.uniform(kw2, (ffn_dim, hidden_dim),
                            minval=-bound2, maxval=bound2, dtype=jnp.float32)
    b2 = jax.random.uniform(kb2, (1, hidden_dim),
                            minval=-bound2, maxval=bound2, dtype=jnp.float32)

    out = ffn_block_forward(x, gamma, beta, w1, b1, w2, b2)
    out = jax.block_until_ready(out)

    ref = _reference(x, gamma, beta, w1, b1, w2, b2)
    assert out.shape == (rows, hidden_dim)
    out_f32 = out.astype(jnp.float32)
    # Tolerance accounts for bf16 MXU operands + bf16 output.
    assert jnp.allclose(out_f32, ref, atol=5e-2, rtol=5e-2), (
        "mismatch vs reference: max abs diff = "
        f"{float(jnp.max(jnp.abs(out_f32 - ref)))}")

    print("KERNEL_OK")
</pallas_src>

<mosaic_0001>
module attributes {stable_mosaic.version = 11 : i64} {
  func.func @_ffn_block_kernel(%arg0: i32, %arg1: memref<256x128xbf16, #tpu.memory_space<vmem>>, %arg2: memref<1x128xf32, #tpu.memory_space<vmem>>, %arg3: memref<1x128xf32, #tpu.memory_space<vmem>>, %arg4: memref<128x256xbf16, #tpu.memory_space<vmem>>, %arg5: memref<1x256xf32, #tpu.memory_space<vmem>>, %arg6: memref<256x128xbf16, #tpu.memory_space<vmem>>, %arg7: memref<1x128xf32, #tpu.memory_space<vmem>>, %arg8: memref<256x128xbf16, #tpu.memory_space<vmem>>) attributes {dimension_semantics = [#tpu.dimension_semantics<parallel>], iteration_bounds = array<i64: 3>, scalar_prefetch = 0 : i64, scratch_operands = 0 : i64, tpu.core_type = #tpu.core_type<tc>, window_params = [{transform_indices = @transform_0, window_bounds = array<i64: 256, 128>}, {pipeline_mode = #tpu.pipeline_mode<synchronous>, transform_indices = @transform_1, window_bounds = array<i64: 1, 128>}, {pipeline_mode = #tpu.pipeline_mode<synchronous>, transform_indices = @transform_2, window_bounds = array<i64: 1, 128>}, {pipeline_mode = #tpu.pipeline_mode<synchronous>, transform_indices = @transform_3, window_bounds = array<i64: 128, 256>}, {pipeline_mode = #tpu.pipeline_mode<synchronous>, transform_indices = @transform_4, window_bounds = array<i64: 1, 256>}, {pipeline_mode = #tpu.pipeline_mode<synchronous>, transform_indices = @transform_5, window_bounds = array<i64: 256, 128>}, {pipeline_mode = #tpu.pipeline_mode<synchronous>, transform_indices = @transform_6, window_bounds = array<i64: 1, 128>}, {transform_indices = @transform_7, window_bounds = array<i64: 256, 128>}]} {
    %c0 = arith.constant 0 : index
    %c0_0 = arith.constant 0 : index
    %0 = vector.load %arg1[%c0, %c0_0] : memref<256x128xbf16, #tpu.memory_space<vmem>>, vector<256x128xbf16>
    %1 = arith.extf %0 : vector<256x128xbf16> to vector<256x128xf32>
    %cst = arith.constant dense<0.000000e+00> : vector<256xf32>
    %2 = vector.multi_reduction <add>, %1, %cst [1] : vector<256x128xf32> to vector<256xf32>
    %3 = vector.shape_cast %2 : vector<256xf32> to vector<256x1xf32>
    %cst_1 = arith.constant 1.280000e+02 : f32
    %4 = vector.broadcast %cst_1 : f32 to vector<256x1xf32>
    %5 = arith.divf %3, %4 : vector<256x1xf32>
    %6 = vector.broadcast %5 : vector<256x1xf32> to vector<256x128xf32>
    %7 = arith.subf %1, %6 : vector<256x128xf32>
    %8 = arith.mulf %7, %7 : vector<256x128xf32>
    %cst_2 = arith.constant dense<0.000000e+00> : vector<256xf32>
    %9 = vector.multi_reduction <add>, %8, %cst_2 [1] : vector<256x128xf32> to vector<256xf32>
    %10 = vector.shape_cast %9 : vector<256xf32> to vector<256x1xf32>
    %cst_3 = arith.constant 1.280000e+02 : f32
    %11 = vector.broadcast %cst_3 : f32 to vector<256x1xf32>
    %12 = arith.divf %10, %11 : vector<256x1xf32>
    %cst_4 = arith.constant 9.99999974E-6 : f32
    %13 = vector.broadcast %cst_4 : f32 to vector<256x1xf32>
    %14 = arith.addf %12, %13 : vector<256x1xf32>
    %15 = math.rsqrt %14 : vector<256x1xf32>
    %16 = vector.broadcast %15 : vector<256x1xf32> to vector<256x128xf32>
    %17 = arith.mulf %7, %16 : vector<256x128xf32>
    %c0_5 = arith.constant 0 : index
    %c0_6 = arith.constant 0 : index
    %18 = vector.load %arg2[%c0_5, %c0_6] : memref<1x128xf32, #tpu.memory_space<vmem>>, vector<1x128xf32>
    %19 = vector.broadcast %18 : vector<1x128xf32> to vector<256x128xf32>
    %20 = arith.mulf %17, %19 : vector<256x128xf32>
    %c0_7 = arith.constant 0 : index
    %c0_8 = arith.constant 0 : index
    %21 = vector.load %arg3[%c0_7, %c0_8] : memref<1x128xf32, #tpu.memory_space<vmem>>, vector<1x128xf32>
    %22 = vector.broadcast %21 : vector<1x128xf32> to vector<256x128xf32>
    %23 = arith.addf %20, %22 : vector<256x128xf32>
    %24 = arith.truncf %23 : vector<256x128xf32> to vector<256x128xbf16>
    %c0_9 = arith.constant 0 : index
    %c0_10 = arith.constant 0 : index
    %25 = vector.load %arg4[%c0_9, %c0_10] : memref<128x256xbf16, #tpu.memory_space<vmem>>, vector<128x256xbf16>
    %cst_11 = arith.constant dense<0.000000e+00> : vector<256x256xf32>
    %26 = tpu.matmul %24, %25, %cst_11 {dimension_numbers = #tpu.dot_dimension_numbers<[1], [0], [0], [1], [0, 0, 1, 1], [], []>} : vector<256x128xbf16>, vector<128x256xbf16>, vector<256x256xf32> -> vector<256x256xf32>
    %c0_12 = arith.constant 0 : index
    %c0_13 = arith.constant 0 : index
    %27 = vector.load %arg5[%c0_12, %c0_13] : memref<1x256xf32, #tpu.memory_space<vmem>>, vector<1x256xf32>
    %28 = vector.broadcast %27 : vector<1x256xf32> to vector<256x256xf32>
    %29 = arith.addf %26, %28 : vector<256x256xf32>
    %cst_14 = arith.constant 5.000000e-01 : f32
    %30 = vector.broadcast %cst_14 : f32 to vector<256x256xf32>
    %31 = arith.mulf %30, %29 : vector<256x256xf32>
    %32 = math.tanh %31 : vector<256x256xf32>
    %cst_15 = arith.constant 5.000000e-01 : f32
    %33 = vector.broadcast %cst_15 : f32 to vector<256x256xf32>
    %34 = arith.mulf %33, %32 : vector<256x256xf32>
    %cst_16 = arith.constant 5.000000e-01 : f32
    %35 = vector.broadcast %cst_16 : f32 to vector<256x256xf32>
    %36 = arith.addf %34, %35 : vector<256x256xf32>
    %37 = arith.mulf %29, %36 : vector<256x256xf32>
    %38 = arith.truncf %37 : vector<256x256xf32> to vector<256x256xbf16>
    %c0_17 = arith.constant 0 : index
    %c0_18 = arith.constant 0 : index
    %39 = vector.load %arg6[%c0_17, %c0_18] : memref<256x128xbf16, #tpu.memory_space<vmem>>, vector<256x128xbf16>
    %cst_19 = arith.constant dense<0.000000e+00> : vector<256x128xf32>
    %40 = tpu.matmul %38, %39, %cst_19 {dimension_numbers = #tpu.dot_dimension_numbers<[1], [0], [0], [1], [0, 0, 1, 1], [], []>} : vector<256x256xbf16>, vector<256x128xbf16>, vector<256x128xf32> -> vector<256x128xf32>
    %c0_20 = arith.constant 0 : index
    %c0_21 = arith.constant 0 : index
    %41 = vector.load %arg7[%c0_20, %c0_21] : memref<1x128xf32, #tpu.memory_space<vmem>>, vector<1x128xf32>
    %42 = vector.broadcast %41 : vector<1x128xf32> to vector<256x128xf32>
    %43 = arith.addf %40, %42 : vector<256x128xf32>
    %44 = arith.addf %1, %43 : vector<256x128xf32>
    %45 = arith.truncf %44 : vector<256x128xf32> to vector<256x128xbf16>
    %c0_22 = arith.constant 0 : index
    %c0_23 = arith.constant 0 : index
    %46 = vector.load %arg8[%c0_22, %c0_23] : memref<256x128xbf16, #tpu.memory_space<vmem>>, vector<256x128xbf16>
    tpu.vector_store %arg8[%c0_22, %c0_23], %45 {strides = array<i32>} : memref<256x128xbf16, #tpu.memory_space<vmem>>, vector<256x128xbf16>,
    return
  }
  func.func @transform_0(%arg0: i32) -> (i32, i32) {
    %c0_i32 = arith.constant 0 : i32
    %c0_i32_0 = arith.constant 0 : i32
    return %arg0, %c0_i32 : i32, i32
  }
  func.func @transform_1(%arg0: i32) -> (i32, i32) {
    %c0_i32 = arith.constant 0 : i32
    %c0_i32_0 = arith.constant 0 : i32
    %c0_i32_1 = arith.constant 0 : i32
    return %c0_i32, %c0_i32_0 : i32, i32
  }
  func.func @transform_2(%arg0: i32) -> (i32, i32) {
    %c0_i32 = arith.constant 0 : i32
    %c0_i32_0 = arith.constant 0 : i32
    %c0_i32_1 = arith.constant 0 : i32
    return %c0_i32, %c0_i32_0 : i32, i32
  }
  func.func @transform_3(%arg0: i32) -> (i32, i32) {
    %c0_i32 = arith.constant 0 : i32
    %c0_i32_0 = arith.constant 0 : i32
    %c0_i32_1 = arith.constant 0 : i32
    return %c0_i32, %c0_i32_0 : i32, i32
  }
  func.func @transform_4(%arg0: i32) -> (i32, i32) {
    %c0_i32 = arith.constant 0 : i32
    %c0_i32_0 = arith.constant 0 : i32
    %c0_i32_1 = arith.constant 0 : i32
    return %c0_i32, %c0_i32_0 : i32, i32
  }
  func.func @transform_5(%arg0: i32) -> (i32, i32) {
    %c0_i32 = arith.constant 0 : i32
    %c0_i32_0 = arith.constant 0 : i32
    %c0_i32_1 = arith.constant 0 : i32
    return %c0_i32, %c0_i32_0 : i32, i32
  }
  func.func @transform_6(%arg0: i32) -> (i32, i32) {
    %c0_i32 = arith.constant 0 : i32
    %c0_i32_0 = arith.constant 0 : i32
    %c0_i32_1 = arith.constant 0 : i32
    return %c0_i32, %c0_i32_0 : i32, i32
  }
  func.func @transform_7(%arg0: i32) -> (i32, i32) {
    %c0_i32 = arith.constant 0 : i32
    %c0_i32_0 = arith.constant 0 : i32
    return %arg0, %c0_i32 : i32, i32
  }
}

</mosaic_0001>

<bundles_post_ra>
// kernel: tpu_custom_call.1
= control target key start
LH: loop header
LB: loop body
LE: loop exit
PB: predicated region body
PF: predicated region fallthrough
CT: control target
= control target key end

     0   :  { %s4703_s0 = inlined_call_operand.hbm [shape: bf16[720,128], index: 0, kind: input, shape index: {}]   ;;  %s4704_s1 = inlined_call_operand.hbm [shape: f32[1,128], index: 1, kind: input, shape index: {}]   ;;  %s4705_s2 = inlined_call_operand.vmem [shape: f32[1,128], index: 2, kind: input, shape index: {}]   ;;  %s4706_s3 = inlined_call_operand.hbm [shape: bf16[128,256], index: 3, kind: input, shape index: {}]   ;;  %s4707_s4 = inlined_call_operand.vmem [shape: f32[1,256], index: 4, kind: input, shape index: {}]   ;;  %s4708_s5 = inlined_call_operand.hbm [shape: bf16[256,128], index: 5, kind: input, shape index: {}]   ;;  %s4709_s6 = inlined_call_operand.vmem [shape: f32[1,128], index: 6, kind: input, shape index: {}]   ;;  %s4710_s7 = inlined_call_operand.hbm [shape: bf16[720,128], index: 7, kind: output, shape index: {}]  }
   0x1   :  { %4739 = sst [smem:[#allocation42_spill]] %s4704_s1 }
   0x2   :  { %4740 = sst [smem:[#allocation43_spill]] %s4706_s3 }
   0x3   :  { %12 = vsyncpa [#allocation3], 0 }
   0x4   :  { %14 = vsyncpa [#allocation3 + $0x1], 0 }
   0x5   :  { %15 = vsyncpa [#allocation6], 0 }
   0x6   :  { %16 = vsyncpa [#allocation9], 0 }
   0x7   :  { %17 = vsyncpa [#allocation4], 0 }
   0x8   :  { %19 = vsyncpa [#allocation4 + $0x1], 0  ;;  %s3241_s24 = smov 0   ;;  %s3243_s25 = smov 0  }
   0x9   :  { %s3245_s26 = smov 0   ;;  %s3247_s27 = smov 0  }
   0xa LB: > { %s3262_s28 = sadd.s32 4294967295, %s3185_s27   ;;  %s2326_s29 = sadd.s32 4294967294, %s3185_s27   ;;  %s3185_s27 = sphi %s3247_s27, %s4856_s27   ;;  %s3181_s26 = sphi %s3245_s26, %s4860_s26   ;;  %s3177_s25 = sphi %s3243_s25, %s4859_s25   ;;  %s3173_s24 = sphi %s3241_s24, %s4858_s24  }
   0xb   : > { %s3266_s30 = sadd.s32 1, %s3185_s27   ;;  %s32_s8 = sadd.s32 1, %s3181_s26 }
   0xc   : > { %4741 = sst [smem:[#allocation15_spill]] %s3266_s30  ;;  %s29_s9 = ssub.s32 %s3185_s27, %s3266_s30 }
   0xd   : > { %p39_p0 = scmp.ne.s32.totalorder %s3181_s26, %s3177_s25  ;;  %p30_p1 = scmp.eq.s32.totalorder %s29_s9, 0 }
   0xe   : > { %p40_p2 = scmp.eq.s32.totalorder %s3185_s27, 0  ;;  %p45_p3 = scmp.ne.s32.totalorder %s3177_s25, %s3173_s24 }
   0xf   : > { %p4713_p4 = scmp.eq.s32.totalorder %s3262_s28, 0  ;;  %p195_p7 = scmp.eq.s32.totalorder %s3262_s28, 2 }
  0x10   : > { %s3278_s10 = scalar_select %p30_p1, %s3181_s26, %s32_s8  }
  0x11   : > { %p3280_p5 = por %p40_p2, %p39_p0  ;;  %p3286_p6 = por %p4713_p4, %p45_p3 }
  0x12   : > { %4742 = sst [smem:[#allocation16_spill]] %s3278_s10  ;;  %p201_p8 = scmp.eq.s32.totalorder %s2326_s29, 2 }
  0x13   : > { %p2327_p9 = scmp.ge.s32.totalorder %s3185_s27, 1  ;;  %p208_p10 = scmp.lt.s32.totalorder %s3185_s27, 4 }
  0x14   : > { %p3293_p11 = por %p195_p7, %p39_p0  ;;  %p3297_p12 = por %p201_p8, %p45_p3 }
  0x15   : > { %p3301_p13 = pnand %p2327_p9, %p208_p10  ;;  %s4748_s1 = sld [smem:[#allocation42_spill]] }
  0x16   : > { %s4746_s14 = scalar_select %p3297_p12, 1, 0 }
  0x17   : > { %p2704_p1 = pneg %p3301_p13  ;;  %s3187_s19 = smov [#allocation5]  }
  0x18   : > { %s222_s20 = sshll.u32 %s3187_s19, 4  ;;  %s4749_s3 = sld [smem:[#allocation43_spill]]  ;;  %s223_s20 = int_to_ptr.vmem [resolvable:$true] %s222_s20 }
  0x19   : > { %p3315_p0 = pnand %p2704_p1, %p4713_p4  ;;  %s3188_s8 = smov [#allocation7]  }
  0x1a   : > { %s236_s9 = sshll.u32 %s3188_s8, 4  ;;  %s251_s19 = sshll.u32 %s4708_s5, 4  ;;  %s237_s9 = int_to_ptr.vmem [resolvable:$true] %s236_s9  ;;  %s252_s19 = int_to_ptr.hbm [resolvable:$true] %s251_s19 }
  0x1b   : > { %s220_s18 = sshll.u32 %s4748_s1, 4  ;;  %s3189_s21 = smov 128   ;;  %s221_s18 = int_to_ptr.hbm [resolvable:$true] %s220_s18 }
  0x1c   : > { %2707 = dma.hbm_to_vmem [thread:$0]  (!%p3315_p0), %s221_s18, 16, %s223_s20, [#allocation6]  }
  0x1d   : > { %s3190_s22 = smov 8   ;;  %s3191_s1 = smov [#allocation8]  }
  0x1e   : > { %s234_s23 = sshll.u32 %s4749_s3, 4  ;;  %s253_s3 = sshll.u32 %s3191_s1, 4  ;;  %s235_s23 = int_to_ptr.hbm [resolvable:$true] %s234_s23  ;;  %s254_s3 = int_to_ptr.vmem [resolvable:$true] %s253_s3 }
  0x1f   : > { %2710 = dma.hbm_to_vmem [thread:$0]  (!%p3315_p0), %s235_s23, 2048, %s237_s9, [#allocation6], %s3189_s21, %s3189_s21, %s3190_s22  }
  0x20   : > { %s3192_s10 = smov 64   ;;  %s3193_s30 = smov 4  }
  0x21   : > { %2713 = dma.hbm_to_vmem [thread:$0]  (!%p3315_p0), %s252_s19, 2048, %s254_s3, [#allocation9], %s3192_s10, %s3192_s10, %s3193_s30  }
  0x22   : > { %p2331_p2 = scmp.ge.s32.totalorder %s3185_s27, 3 }
  0x24   : > { %266 = sbr.rel (%p2331_p2) target bundleno = 77 (0x4d), region = 40 }
  0x29   : > { %269 = sbr.rel (!%p3280_p5) target bundleno = 77 (0x4d), region = 44  ;;  %s270_s18 = sand.u32 (%p3280_p5), 1, %s3181_s26  }
  0x2a   : > { %s2333_s20 = sshll.u32 (%p3280_p5), %s3185_s27, 5  ;;  %s2332_s8 = sshll.u32 (%p3280_p5), %s270_s18, 7 }
  0x2b   : > { %s276_s23 = ssub.s32 (%p3280_p5), 90, %s2333_s20  ;;  %s3336_s3 = scalar_lea.sflag (%p3280_p5), [#allocation3], %s270_s18 }
  0x2c   : > { %p277_p3 = scmp.lt.s32.totalorder (%p3280_p5), %s276_s23, 32  ;;  %s274_s30 = scalar_lea.vmem (%p3280_p5), [#allocation2], %s2332_s8 }
  0x2e   : > { %s4862_s23 = smov (!%p277_p3, %s276_s23), 32 }
  0x2f   : > { %s2334_s1 = sshll.u32 %s4862_s23, 2 }
  0x30   : > { %s280_s9 = ssub.s32 128, %s2334_s1 }
  0x31   : > { %s281_s29 = sshll.u32 %s280_s9, 4 }
  0x32   : > { %282 = vsyncadd %s3336_s3, %s281_s29  ;;  %p3339_p5 = scmp.ne.s32.totalorder %s2334_s1, 0  ;;  %s2482_s11 = sshll.u32 %s3185_s27, 7 }
  0x33   : > { %s285_s19 = scalar_lea.hbm %s4703_s0, %s2482_s11  ;;  %s3347_s21 = sshll.u32 %s274_s30, 4  ;;  %s290_s21 = int_to_ptr.vmem [resolvable:$true] %s3347_s21 }
  0x34   : > { %s287_s22 = sshll.u32 %s285_s19, 4  ;;  %s2338_s18 = sshll.u32 %s4862_s23, 6  ;;  %s3350_s22 = int_to_ptr.hbm [resolvable:$true] %s287_s22 }
  0x35   : > { %s3061_s20 = sshra.s32 %s3350_s22, 4  ;;  %s3063_s8 = sshrl.u32 %s2338_s18, 4  ;;  %s3062_s20 = int_to_ptr.hbm [resolvable:$true] %s3061_s20 }
  0x36   : > { %s3068_s1 = scalar_lea.hbm %s3062_s20, %s3063_s8  ;;  %s3072_s30 = scalar_lea.hbm %s4703_s0, 360 }
  0x37   : > { %p3069_p7 = scmp.ne.s32.totalorder %s3062_s20, %s3068_s1  ;;  %p3073_p10 = scmp.lt.s32.totalorder %s3062_s20, %s4703_s0 }
  0x38   : > { %p3074_p1 = scmp.lt.s32.totalorder %s3072_s30, %s3068_s1 }
  0x39   : > { %p3070_p8 = pnand %p3069_p7, %p3339_p5 }
  0x3a   : > { %p3075_p0 = por %p3074_p1, %p3073_p10 }
  0x3b   : > { %p3071_p9 = pneg %p3070_p8 }
  0x3d   : > { %p3076_p2 = pnand %p3075_p0, %p3071_p9 }
  0x3f   : > { %3079 = shalt.err (!%p3076_p2)
}
  0x40   : > { %s3080_s17 = sshra.s32 %s290_s21, 4  ;;  %s3194_s9 = smov [#allocation2]   ;;  %s3081_s17 = int_to_ptr.vmem [resolvable:$true] %s3080_s17 }
  0x41   : > { %s3087_s19 = scalar_lea.vmem %s3081_s17, %s3063_s8  ;;  %s3091_s29 = scalar_lea.vmem %s3194_s9, 256 }
  0x42   : > { %p3088_p3 = scmp.ne.s32.totalorder %s3081_s17, %s3087_s19  ;;  %p3093_p4 = scmp.lt.s32.totalorder %s3091_s29, %s3087_s19 }
  0x44   : > { %p3089_p7 = pnand %p3088_p3, %p3339_p5 }
  0x46   : > { %p3090_p8 = pneg %p3089_p7 }
  0x48   : > { %p3095_p12 = pnand %p3093_p4, %p3090_p8 }
  0x4a   : > { %3098 = shalt.err (!%p3095_p12)
}
  0x4b   : > { %s3195_s20 = smov 64   ;;  %s3196_s1 = smov 4  }
  0x4c   : > { %295 = dma.hbm_to_vmem [thread:$0]  (%p3339_p5), %s3350_s22, %s2338_s18, %s290_s21, %s3336_s3, %s3195_s20, %s3195_s20, %s3196_s1  }
  0x4d PF: > { %301 = sbr.rel (%p3301_p13) target bundleno = 1240 (0x4d8), region = 48 }
  0x52   : > { %s3379_s8 = sand.u32 1, %s3177_s25  }
  0x53   : > { %s2340_s30 = sshll.u32 %s3379_s8, 7  ;;  %s304_s11 = scalar_lea.sflag [#allocation3], %s3379_s8 }
  0x54   : > { %s3385_s16 = scalar_lea.vmem [#allocation2], %s2340_s30 }
  0x55   : > { %3156 = dma.done.wait (%p3286_p6), %s304_s11, 2048  }
  0x56   : > { %3158 = vsyncadd (%p3286_p6), %s304_s11, 4294965248  ;;  %p4752_p4 = scmp.eq.s32.totalorder %s3262_s28, 0 }
  0x58   : > { %3160 = dma.done.wait (%p4752_p4), [#allocation6], 2064   ;;  %p4753_p12 = pmov %p4752_p4 }
  0x59   : > { %p4754_p13 = pmov %p4752_p4 }
  0x5a   : > { %3162 = vsyncadd (%p4753_p12), [#allocation6], 4294965232 }
  0x5b   : > { %3164 = dma.done.wait (%p4754_p13), [#allocation9], 2048   ;;  %p4755_p5 = pmov %p4752_p4 }
  0x5c   : > { %v2660_v0 = vld [vmem:[%s3385_s16 + $0x8] sm:$0xff]   ;;  %v2517_v1 = vld [vmem:[%s3385_s16] sm:$0xff]   ;;  %v2661_v2 = vld [vmem:[%s3385_s16 + $0x10] sm:$0xff]   ;;  %v3197_v11 = vmov 128.0   ;;  %s4275_s17 = scalar_lea.vmem [#allocation10], %s2340_s30  ;;  %s2202_s1 = scalar_lea.sflag [#allocation4], %s3379_s8 }
  0x5d   : > { %3166 = vsyncadd (%p4755_p5), [#allocation9], 4294965248  ;;  %v3402_v3 = vunpack.c.l.bf16 %v2660_v0  ;;  %v3404_v4 = vunpack.c.l.bf16 %v2517_v1  ;;  %v3406_v5 = vunpack.c.l.bf16 %v2661_v2  ;;  %v3411_v6 = vunpack.c.h.bf16 %v2660_v0  ;;  %v2662_v9 = vld [vmem:[%s3385_s16 + $0x18] sm:$0xff]   ;;  %v2663_v38 = vld [vmem:[%s3385_s16 + $0x20] sm:$0xff]   ;;  %s2474_s30 = sshll.u32 (%p3293_p11), %s3262_s28, 5 }
  0x5e   : > { %v3413_v7 = vunpack.c.h.bf16 %v2517_v1  ;;  %v3415_v8 = vunpack.c.h.bf16 %v2661_v2  ;;  %v3421_v10 = vunpack.c.l.bf16 %v2662_v9  ;;  %2772 = vrcp.f32 %v3197_v11  ;;  %v2664_v44 = vld [vmem:[%s3385_s16 + $0x28] sm:$0xff]   ;;  %v2665_v51 = vld [vmem:[%s3385_s16 + $0x30] sm:$0xff]   ;;  %v3493_v56 = vld [vmem:[%s3385_s16 + $0x38] sm:$0xff]   ;;  %s2210_s11 = ssub.s32 (%p3293_p11), 90, %s2474_s30 }
  0x5f   : > { %432 = vadd.xlane.f32.xlu1 %v3402_v3  ;;  %428 = vadd.xlane.f32.xlu0 %v3404_v4  ;;  %v3440_v30 = vunpack.c.h.bf16 %v2662_v9  ;;  %v3458_v40 = vunpack.c.l.bf16 %v2663_v38  ;;  %v3468_v46 = vunpack.c.h.bf16 %v2664_v44  ;;  %v3473_v49 = vunpack.c.h.bf16 %v2663_v38  ;;  %v2403_v58 = vld [vmem:[#allocation7 + $0x70] sm:$0xf]  ;;  %v2498_v59 = vld [vmem:[#allocation7 + $0x74] sm:$0xf0]  ;;  %v2497_v60 = vld [vmem:[#allocation7 + $0x74] sm:$0xf] }
  0x60   : > { %436 = vadd.xlane.f32.xlu2 %v3406_v5  ;;  %v3481_v52 = vunpack.c.l.bf16 %v2665_v51  ;;  %v3485_v54 = vunpack.c.l.bf16 %v2664_v44  ;;  %v3489_v55 = vunpack.c.h.bf16 %v2665_v51  ;;  %v3496_v57 = vunpack.c.l.bf16 %v3493_v56  ;;  %v2405_v62 = vld [vmem:[#allocation7 + $0x78] sm:$0xf0]  ;;  %v2395_v0 = vld [vmem:[#allocation7 + $0x60] sm:$0xf]  ;;  %v2496_v1 = vld [vmem:[#allocation7 + $0x64] sm:$0xf0] }
  0x61   : > { %4756 = vst [vmem:[#allocation17_spill] sm:$0xff] %v3440_v30  ;;  %v2404_v61 = vor.u32 %v2498_v59, %v2403_v58  ;;  %v2408_v63 = vor.u32 %v2497_v60, %v2405_v62  ;;  %v2495_v2 = vld [vmem:[#allocation7 + $0x64] sm:$0xf]  ;;  %v2396_v9 = vor.u32 %v2496_v1, %v2395_v0  ;;  %v2397_v11 = vld [vmem:[#allocation7 + $0x68] sm:$0xf0]  ;;  %p2211_p6 = scmp.lt.s32.totalorder (%p3293_p11), %s2210_s11, 32 }
  0x62   : > { %4757 = vst [vmem:[#allocation18_spill] sm:$0xff] %v3458_v40  ;;  %v2363_v38 = vld [vmem:[#allocation7 + $0x20] sm:$0xf]  ;;  %v2365_v44 = vld [vmem:[#allocation7 + $0x28] sm:$0xf0] }
  0x63   : > { %4758 = vst [vmem:[#allocation19_spill] sm:$0xff] %v3468_v46  ;;  %1265 = vmatpush.bf16.msra.mxu0 %v2404_v61  ;;  %1354 = vmatpush.bf16.msra.mxu1 %v2408_v63  ;;  %v2485_v51 = vld [vmem:[#allocation7 + $0x14] sm:$0xf]  ;;  %v2357_v59 = vld [vmem:[#allocation7 + $0x18] sm:$0xf0] }
  0x64   : > { %v2773_v12 = vpop.eup %2772  ;;  %4759 = vst [vmem:[#allocation20_spill] sm:$0xff] %v3473_v49  ;;  %v2360_v61 = vor.u32 %v2485_v51, %v2357_v59  ;;  %v2347_v63 = vld [vmem:[#allocation7] sm:$0xf]  ;;  %v2484_v0 = vld [vmem:[#allocation7 + $0x4] sm:$0xf0] }
  0x65   : > { %v493_v13 = vmul.f32 128.0, %v2773_v12  ;;  %vm497_vm0 = vweird.f32 %v2773_v12  ;;  %4760 = vst [vmem:[#allocation21_spill] sm:$0xff] %v3481_v52  ;;  %v2348_v1 = vor.u32 %v2484_v0, %v2347_v63 }
  0x66   : > { %4761 = vst [vmem:[#allocation22_spill] sm:$0xff] %v3485_v54 }
  0x67   : > { %434 = vadd.xlane.f32.xlu1 %v3411_v6  ;;  %430 = vadd.xlane.f32.xlu0 %v3413_v7  ;;  %v494_v14 = vsub.f32 1.0, %v493_v13  ;;  %4762 = vst [vmem:[#allocation23_spill] sm:$0xff] %v3489_v55  ;;  %v2387_v13 = vld [vmem:[#allocation7 + $0x50] sm:$0xf] }
  0x68   : > { %438 = vadd.xlane.f32.xlu2 %v3415_v8  ;;  %4763 = vst [vmem:[#allocation24_spill] sm:$0xff] %v3496_v57  ;;  %1266 = vmatpush.bf16.msra.mxu0 %v2396_v9  ;;  %v2349_v9 = vld [vmem:[#allocation7 + $0x8] sm:$0xf0] }
  0x69   : > { %v495_v15 = vmul.f32 %v2773_v12, %v494_v14  ;;  %v2494_v14 = vld [vmem:[#allocation7 + $0x54] sm:$0xf0] }
  0x6b   : > { %v496_v16 = vadd.f32 %v2773_v12, %v495_v15  ;;  %v2493_v15 = vld [vmem:[#allocation7 + $0x54] sm:$0xf] }
  0x6d   : > { %v3424_v17 = vsel %vm497_vm0, %v2773_v12, %v496_v16  ;;  %v2400_v12 = vor.u32 %v2495_v2, %v2397_v11  ;;  %v2388_v16 = vor.u32 %v2494_v14, %v2387_v13  ;;  %v2483_v2 = vld [vmem:[#allocation7 + $0x4] sm:$0xf] }
  0x6e   : > { %v2352_v11 = vor.u32 %v2483_v2, %v2349_v9 }
  0x6f   : > { %1355 = vmatpush.bf16.msra.mxu1 %v2400_v12  ;;  %1267 = vmatpush.bf16.msra.mxu0 %v2388_v16 }
  0x70   : > { %440 = vadd.xlane.f32.xlu2 %v3421_v10 }
  0xd2   : > { %v433_v18 = vpop.xlane.xlu1 %432  ;;  %v429_v19 = vpop.xlane.xlu0 %428 }
  0xd3   : > { %v499_v20 = vmul.f32 %v3424_v17, %v429_v19  ;;  %v437_v22 = vpop.xlane.xlu2 %436  ;;  %v501_v32 = vmul.f32 %v3424_v17, %v433_v18  ;;  %v2389_v18 = vld [vmem:[#allocation7 + $0x58] sm:$0xf0] }
  0xd4   : > { %v503_v31 = vmul.f32 %v3424_v17, %v437_v22  ;;  %v2392_v19 = vor.u32 %v2493_v15, %v2389_v18  ;;  %v2492_v22 = vld [vmem:[#allocation7 + $0x44] sm:$0xf0] }
  0xd5   : > { %v3428_v21 = vsub.f32 %v3404_v4, %v499_v20  ;;  %v3453_v37 = vsub.f32 %v3402_v3, %v501_v32  ;;  %v2379_v20 = vld [vmem:[#allocation7 + $0x40] sm:$0xf]  ;;  %v2489_v32 = vld [vmem:[#allocation7 + $0x34] sm:$0xf] }
  0xd6   : > { %v3450_v36 = vsub.f32 %v3406_v5, %v503_v31  ;;  %1356 = vmatpush.bf16.msra.mxu1 %v2392_v19  ;;  %v2490_v31 = vld [vmem:[#allocation7 + $0x34] sm:$0xf0] }
  0xd7   : > { %v563_v23 = vmul.f32 %v3428_v21, %v3428_v21  ;;  %v565_v42 = vmul.f32 %v3453_v37, %v3453_v37 }
  0xd8   : > { %v567_v39 = vmul.f32 %v3450_v36, %v3450_v36 }
  0xd9   : > { %595 = vadd.xlane.f32.xlu0 %v563_v23  ;;  %v2491_v23 = vld [vmem:[#allocation7 + $0x44] sm:$0xf] }
  0xda   : > { %v435_v24 = vpop.xlane.xlu1 %434  ;;  %v431_v25 = vpop.xlane.xlu0 %430 }
  0xdb   : > { %v502_v26 = vmul.f32 %v3424_v17, %v435_v24  ;;  %v500_v27 = vmul.f32 %v3424_v17, %v431_v25  ;;  %v439_v35 = vpop.xlane.xlu2 %438  ;;  %v2380_v24 = vor.u32 %v2492_v22, %v2379_v20  ;;  %v2381_v25 = vld [vmem:[#allocation7 + $0x48] sm:$0xf0] }
  0xdc   : > { %v504_v41 = vmul.f32 %v3424_v17, %v439_v35 }
  0xdd   : > { %v3435_v28 = vsub.f32 %v3411_v6, %v502_v26  ;;  %v3438_v29 = vsub.f32 %v3413_v7, %v500_v27  ;;  %v2384_v26 = vor.u32 %v2491_v23, %v2381_v25  ;;  %1268 = vmatpush.bf16.msra.mxu0 %v2380_v24  ;;  %v2371_v27 = vld [vmem:[#allocation7 + $0x30] sm:$0xf] }
  0xde   : > { %v3465_v43 = vsub.f32 %v3415_v8, %v504_v41  ;;  %v2487_v41 = vld [vmem:[#allocation7 + $0x24] sm:$0xf] }
  0xdf   : > { %v566_v33 = vmul.f32 %v3435_v28, %v3435_v28  ;;  %v564_v34 = vmul.f32 %v3438_v29, %v3438_v29  ;;  %1357 = vmatpush.bf16.msra.mxu1 %v2384_v26 }
  0xe0   : > { %v568_v47 = vmul.f32 %v3465_v43, %v3465_v43 }
  0xe1   : > { %601 = vadd.xlane.f32.xlu2 %v566_v33  ;;  %442 = vadd.xlane.f32.xlu0 %v3440_v30  ;;  %v2372_v33 = vor.u32 %v2490_v31, %v2371_v27 }
  0xe2   : > { %597 = vadd.xlane.f32.xlu1 %v564_v34  ;;  %v2373_v34 = vld [vmem:[#allocation7 + $0x38] sm:$0xf0] }
  0xe3   : > { %v441_v45 = vpop.xlane.xlu2 %440  ;;  %v2376_v35 = vor.u32 %v2489_v32, %v2373_v34  ;;  %1269 = vmatpush.bf16.msra.mxu0 %v2372_v33 }
  0xe4   : > { %v505_v48 = vmul.f32 %v3424_v17, %v441_v45  ;;  %v2368_v45 = vor.u32 %v2487_v41, %v2365_v44 }
  0xe5   : > { %1358 = vmatpush.bf16.msra.mxu1 %v2376_v35 }
  0xe6   : > { %v3477_v50 = vsub.f32 %v3421_v10, %v505_v48  ;;  %v2486_v48 = vld [vmem:[#allocation7 + $0x14] sm:$0xf0] }
  0xe8   : > { %v569_v53 = vmul.f32 %v3477_v50, %v3477_v50 }
  0xe9   : > { %603 = vadd.xlane.f32.xlu2 %v567_v39  ;;  %444 = vadd.xlane.f32.xlu0 %v3458_v40  ;;  %v2488_v39 = vld [vmem:[#allocation7 + $0x24] sm:$0xf0] }
  0xea   : > { %599 = vadd.xlane.f32.xlu1 %v565_v42  ;;  %v2364_v42 = vor.u32 %v2488_v39, %v2363_v38  ;;  %1359 = vmatpush.bf16.msra.mxu1 %v2368_v45 }
  0xec   : > { %1270 = vmatpush.bf16.msra.mxu0 %v2364_v42 }
  0xee   : > { %1360 = vmatpush.bf16.msra.mxu1 %v2360_v61 }
  0xf1   : > { %450 = vadd.xlane.f32.xlu2 %v3468_v46  ;;  %605 = vadd.xlane.f32.xlu0 %v568_v47  ;;  %v2355_v47 = vld [vmem:[#allocation7 + $0x10] sm:$0xf] }
  0xf2   : > { %446 = vadd.xlane.f32.xlu1 %v3473_v49  ;;  %v2356_v58 = vor.u32 %v2486_v48, %v2355_v47  ;;  %1361 = vmatpush.bf16.msra.mxu1 %v2352_v11 }
  0xf4   : > { %1271 = vmatpush.bf16.msra.mxu0 %v2356_v58 }
  0xf8   : > { %1272 = vmatpush.bf16.msra.mxu0 %v2348_v1 }
  0xf9   : > { %452 = vadd.xlane.f32.xlu2 %v3481_v52  ;;  %607 = vadd.xlane.f32.xlu0 %v569_v53 }
  0xfa   : > { %448 = vadd.xlane.f32.xlu1 %v3485_v54 }
 0x101   : > { %454 = vadd.xlane.f32.xlu0 %v3489_v55 }
 0x109   : > { %456 = vadd.xlane.f32.xlu0 %v3496_v57 }
 0x14c   : > { %v596_v53 = vpop.xlane.xlu0 %595 }
 0x14d   : > { %v659_v60 = vmul.f32 %v596_v53, %v3424_v17 }
 0x14f   : > { %v691_v62 = vadd.f32 1e-05, %v659_v60 }
 0x151   : > { %2774 = vrsqrt.f32 %v691_v62  ;;  %vm729_vm2 = vweird.f32 %v691_v62 }
 0x154   : > { %v602_v12 = vpop.xlane.xlu2 %601  ;;  %v443_v13 = vpop.xlane.xlu0 %442 }
 0x155   : > { %v662_v14 = vmul.f32 %v602_v12, %v3424_v17  ;;  %v598_v15 = vpop.xlane.xlu1 %597  ;;  %v506_v16 = vmul.f32 %v3424_v17, %v443_v13 }
 0x156   : > { %v660_v18 = vmul.f32 %v598_v15, %v3424_v17 }
 0x157   : > { %v2775_v19 = vpop.eup %2774  ;;  %v3503_v20 = vadd.f32 1e-05, %v662_v14  ;;  %v3506_v22 = vsub.f32 %v3440_v30, %v506_v16 }
 0x158   : > { %v724_v23 = vmul.f32 %v2775_v19, %v691_v62  ;;  %v692_v24 = vadd.f32 1e-05, %v660_v18  ;;  %vm730_vm1 = vweird.f32 %v2775_v19 }
 0x159   : > { %2776 = vrsqrt.f32 %v3503_v20  ;;  %v570_v25 = vmul.f32 %v3506_v22, %v3506_v22  ;;  %vm3528_vm5 = vmor %vm729_vm2, %vm730_vm1  ;;  %vm759_vm9 = vweird.f32 %v3503_v20 }
 0x15a   : > { %v725_v26 = vmul.f32 %v2775_v19, %v724_v23  ;;  %2778 = vrsqrt.f32 %v692_v24  ;;  %vm739_vm3 = vweird.f32 %v692_v24 }
 0x15b   : > { %609 = vadd.xlane.f32.xlu1 %v570_v25 }
 0x15c   : > { %v726_v27 = vmul.f32 0.5, %v725_v26  ;;  %v604_v31 = vpop.xlane.xlu2 %603  ;;  %v445_v32 = vpop.xlane.xlu0 %444 }
 0x15d   : > { %v600_v33 = vpop.xlane.xlu1 %599  ;;  %v507_v34 = vmul.f32 %v3424_v17, %v445_v32  ;;  %v663_v48 = vmul.f32 %v604_v31, %v3424_v17  ;;  %v3565_v32 = vld [vmem:[#allocation5] ss:$0 sm:$0xff] }
 0x15e   : > { %v661_v35 = vmul.f32 %v600_v33, %v3424_v17  ;;  %v727_v39 = vsub.f32 1.5, %v726_v27  ;;  %v3557_v27 = vunpack.c.h.bf16 %v3493_v56 }
 0x15f   : > { %v3513_v38 = vpop.eup %2776  ;;  %v3516_v41 = vsub.f32 %v3458_v40, %v507_v34  ;;  %v3533_v11 = vadd.f32 1e-05, %v663_v48 }
 0x160   : > { %v2779_v42 = vpop.eup %2778  ;;  %v3518_v44 = vadd.f32 1e-05, %v661_v35  ;;  %v754_v47 = vmul.f32 %v3513_v38, %v3503_v20  ;;  %v728_v53 = vmul.f32 %v2775_v19, %v727_v39  ;;  %4768 = vst [vmem:[#allocation25_spill] sm:$0xff] %v3557_v27  ;;  %vm760_vm10 = vweird.f32 %v3513_v38 }
 0x161   : > { %v734_v45 = vmul.f32 %v2779_v42, %v692_v24  ;;  %v571_v51 = vmul.f32 %v3516_v41, %v3516_v41  ;;  %vm740_vm4 = vweird.f32 %v2779_v42  ;;  %vm3618_vm12 = vmor %vm759_vm9, %vm760_vm10  ;;  %vm769_vm15 = vweird.f32 %v3533_v11 }
 0x162   : > { %2780 = vrsqrt.f32 %v3518_v44  ;;  %v755_v9 = vmul.f32 %v3513_v38, %v754_v47  ;;  %v732_v15 = vsel %vm3528_vm5, %v2775_v19, %v728_v53  ;;  %vm3546_vm6 = vmor %vm739_vm3, %vm740_vm4  ;;  %vm749_vm7 = vweird.f32 %v3518_v44 }
 0x163   : > { %v735_v58 = vmul.f32 %v2779_v42, %v734_v45  ;;  %611 = vadd.xlane.f32.xlu1 %v571_v51  ;;  %v1043_v31 = vmul.f32 %v732_v15, %v3428_v21  ;;  %v2667_v51 = vld [vmem:[%s3385_s16 + $0x40] sm:$0xff]  }
 0x164   : > { %v451_v59 = vpop.xlane.xlu2 %450  ;;  %v606_v60 = vpop.xlane.xlu0 %605  ;;  %v756_v33 = vmul.f32 0.5, %v755_v9  ;;  %v3597_v2 = vunpack.c.l.bf16 %v2667_v51 }
 0x165   : > { %v736_v61 = vmul.f32 0.5, %v735_v58  ;;  %v510_v63 = vmul.f32 %v3424_v17, %v451_v59  ;;  %v447_v0 = vpop.xlane.xlu1 %446  ;;  %v664_v1 = vmul.f32 %v606_v60, %v3424_v17  ;;  %v3583_v59 = vld [vmem:[%s4705_s2] ss:$0 sm:$0xff] }
 0x166   : > { %v508_v62 = vmul.f32 %v3424_v17, %v447_v0  ;;  %v757_v60 = vsub.f32 1.5, %v756_v33  ;;  %4769 = vst [vmem:[#allocation26_spill] sm:$0xff] %v3597_v2 }
 0x167   : > { %v737_v12 = vsub.f32 1.5, %v736_v61  ;;  %v3537_v13 = vsub.f32 %v3468_v46, %v510_v63  ;;  %v3539_v14 = vadd.f32 1e-05, %v664_v1 }
 0x168   : > { %v3543_v16 = vpop.eup %2780  ;;  %v3551_v23 = vsub.f32 %v3473_v49, %v508_v62 }
 0x169   : > { %v738_v25 = vmul.f32 %v2779_v42, %v737_v12  ;;  %v744_v26 = vmul.f32 %v3543_v16, %v3518_v44  ;;  %2782 = vrsqrt.f32 %v3539_v14  ;;  %v574_v19 = vmul.f32 %v3537_v13, %v3537_v13 }
 0x16a   : > { %2784 = vrsqrt.f32 %v3533_v11  ;;  %v572_v24 = vmul.f32 %v3551_v23, %v3551_v23  ;;  %vm750_vm8 = vweird.f32 %v3543_v16  ;;  %vm779_vm13 = vweird.f32 %v3539_v14 }
 0x16b   : > { %v745_v34 = vmul.f32 %v3543_v16, %v744_v26  ;;  %v742_v56 = vsel %vm3546_vm6, %v2779_v42, %v738_v25  ;;  %617 = vadd.xlane.f32.xlu0 %v574_v19  ;;  %458 = vadd.xlane.f32.xlu1 %v3557_v27  ;;  %v1079_v42 = vmul.f32 %v3565_v32, %v1043_v31  ;;  %vm3607_vm11 = vmor %vm749_vm7, %vm750_vm8 }
 0x16c   : > { %613 = vadd.xlane.f32.xlu2 %v572_v24  ;;  %v453_v35 = vpop.xlane.xlu2 %452  ;;  %v3570_v39 = vpop.xlane.xlu0 %607  ;;  %v1044_v45 = vmul.f32 %v742_v56, %v3438_v29  ;;  %v758_v26 = vmul.f32 %v3513_v38, %v757_v60  ;;  %v2668_v56 = vld [vmem:[%s3385_s16 + $0x48] sm:$0xff]  }
 0x16d   : > { %v746_v47 = vmul.f32 0.5, %v745_v34  ;;  %v511_v21 = vmul.f32 %v3424_v17, %v453_v35  ;;  %v449_v48 = vpop.xlane.xlu1 %448  ;;  %v1115_v18 = vadd.f32 %v3583_v59, %v1079_v42 }
 0x16e   : > { %v509_v53 = vmul.f32 %v3424_v17, %v449_v48  ;;  %v1080_v58 = vmul.f32 %v3565_v32, %v1044_v45  ;;  %v3636_v48 = vunpack.c.h.bf16 %v2668_v56 }
 0x16f   : > { %v3585_v29 = vpop.eup %2782  ;;  %v747_v61 = vsub.f32 1.5, %v746_v47  ;;  %v3589_v63 = vsub.f32 %v3481_v52, %v511_v21  ;;  %v762_v21 = vsel %vm3618_vm12, %v3513_v38, %v758_v26 }
 0x170   : > { %v3591_v0 = vpop.eup %2784  ;;  %v3595_v1 = vsub.f32 %v3485_v54, %v509_v53  ;;  %v774_v62 = vmul.f32 %v3585_v29, %v3539_v14  ;;  %v1116_v25 = vadd.f32 %v3583_v59, %v1080_v58  ;;  %4774 = vst [vmem:[#allocation27_spill] sm:$0xff] %v3636_v48  ;;  %v3638_v53 = vunpack.c.h.bf16 %v2667_v51 }
 0x171   : > { %v748_v9 = vmul.f32 %v3543_v16, %v747_v61  ;;  %v575_v12 = vmul.f32 %v3589_v63, %v3589_v63  ;;  %v764_v19 = vmul.f32 %v3591_v0, %v3533_v11  ;;  %v1046_v60 = vmul.f32 %v762_v21, %v3435_v28  ;;  %v3679_v21 = vld [vmem:[%s3385_s16 + $0x58] sm:$0xff]  }
 0x172   : > { %v573_v15 = vmul.f32 %v3595_v1, %v3595_v1  ;;  %v1147_v44 = vpack.c.bf16 %v1116_v25, %v1115_v18  ;;  %v775_v33 = vmul.f32 %v3585_v29, %v774_v62  ;;  %4775 = vst [vmem:[#allocation28_spill] sm:$0xff] %v3638_v53  ;;  %vm780_vm14 = vweird.f32 %v3585_v29 }
 0x173   : > { %619 = vadd.xlane.f32.xlu0 %v575_v12  ;;  %460 = vadd.xlane.f32.xlu1 %v3597_v2  ;;  %v752_v35 = vsel %vm3607_vm11, %v3543_v16, %v748_v9  ;;  %v765_v45 = vmul.f32 %v3591_v0, %v764_v19  ;;  %v2669_v12 = vld [vmem:[%s3385_s16 + $0x50] sm:$0xff]   ;;  %v3657_v18 = vunpack.c.l.bf16 %v2668_v56  ;;  %vm770_vm0 = vweird.f32 %v3591_v0  ;;  %vm781_vm1 = vmor %vm779_vm13, %vm780_vm14 }
 0x174   : > { %615 = vadd.xlane.f32.xlu2 %v573_v15  ;;  %v455_v31 = vpop.xlane.xlu0 %454  ;;  %1273 = vmatmul.bf16.vlgmr.msra.gmra.mxu0 %v1147_v44  ;;  %v1045_v42 = vmul.f32 %v752_v35, %v3453_v37  ;;  %v776_v58 = vmul.f32 0.5, %v775_v33  ;;  %v1082_v37 = vmul.f32 %v3565_v32, %v1046_v60  ;;  %v3655_v15 = vunpack.c.l.bf16 %v2669_v12  ;;  %vm771_vm2 = vmor %vm769_vm15, %vm770_vm0 }
 0x175   : > { %v512_v34 = vmul.f32 %v3424_v17, %v455_v31  ;;  %1362 = vmatmul.bf16.vlgmr.msra.gmra.mxu1 %v1147_v44  ;;  %v766_v61 = vmul.f32 0.5, %v765_v45  ;;  %4777 = vst [vmem:[#allocation30_spill] sm:$0xff] %v3657_v18 }
 0x176   : > { %v1081_v38 = vmul.f32 %v3565_v32, %v1045_v42  ;;  %v777_v62 = vsub.f32 1.5, %v776_v58  ;;  %4776 = vst [vmem:[#allocation29_spill] sm:$0xff] %v3655_v15  ;;  %v1118_v19 = vadd.f32 %v3583_v59, %v1082_v37  ;;  %v3683_v42 = vunpack.c.l.bf16 %v3679_v21  ;;  %v2505_v37 = vld [vmem:[#allocation8 + $0x30] sm:$0xff] }
 0x177   : > { %v3631_v47 = vsub.f32 %v3489_v55, %v512_v34  ;;  %v767_v20 = vsub.f32 1.5, %v766_v61  ;;  %v3672_v34 = vunpack.c.h.bf16 %v2669_v12 }
 0x178   : > { %v1117_v25 = vadd.f32 %v3583_v59, %v1081_v38  ;;  %v778_v26 = vmul.f32 %v3585_v29, %v777_v62  ;;  %4779 = vst [vmem:[#allocation32_spill] sm:$0xff] %v3683_v42  ;;  %v2506_v38 = vld [vmem:[#allocation8 + $0x38] sm:$0xff] }
 0x179   : > { %v576_v16 = vmul.f32 %v3631_v47, %v3631_v47  ;;  %v768_v24 = vmul.f32 %v3591_v0, %v767_v20  ;;  %4778 = vst [vmem:[#allocation31_spill] sm:$0xff] %v3672_v34  ;;  %v2514_v62 = vld [vmem:[#allocation8 + $0x78] sm:$0xff]  ;;  %1927 = vmatpush.bf16.msra.mxu2 %v2506_v38  ;;  %v2513_v20 = vld [vmem:[#allocation8 + $0x70] sm:$0xff] }
 0x17a   : > { %v1148_v44 = vpack.c.bf16 %v1118_v19, %v1117_v25  ;;  %v782_v11 = vsel %vm781_vm1, %v3585_v29, %v778_v26  ;;  %2016 = vmatpush.bf16.msra.mxu3 %v2514_v62  ;;  %v2504_v26 = vld [vmem:[#allocation8 + $0x28] sm:$0xff] }
 0x17b   : > { %466 = vadd.xlane.f32.xlu0 %v3636_v48  ;;  %621 = vadd.xlane.f32.xlu1 %v576_v16  ;;  %v772_v31 = vsel %vm771_vm2, %v3591_v0, %v768_v24  ;;  %v1048_v33 = vmul.f32 %v782_v11, %v3465_v43 }
 0x17c   : > { %462 = vadd.xlane.f32.xlu2 %v3638_v53  ;;  %v457_v9 = vpop.xlane.xlu0 %456  ;;  %v1047_v56 = vmul.f32 %v772_v31, %v3450_v36  ;;  %v665_v36 = vmul.f32 %v3570_v39, %v3424_v17 }
 0x17d   : > { %v513_v51 = vmul.f32 %v3424_v17, %v457_v9  ;;  %v1084_v35 = vmul.f32 %v3565_v32, %v1048_v33  ;;  %1928 = vmatpush.bf16.msra.mxu2 %v2505_v37  ;;  %v2503_v33 = vld [vmem:[#allocation8 + $0x20] sm:$0xff] }
 0x17e   : > { %v1083_v45 = vmul.f32 %v3565_v32, %v1047_v56  ;;  %v697_v58 = vadd.f32 1e-05, %v665_v36  ;;  %2017 = vmatpush.bf16.msra.mxu3 %v2513_v20  ;;  %v2511_v56 = vld [vmem:[#allocation8 + $0x60] sm:$0xff] }
 0x17f   : > { %v3653_v28 = vsub.f32 %v3496_v57, %v513_v51  ;;  %v1120_v29 = vadd.f32 %v3583_v59, %v1084_v35 }
 0x180   : > { %v1119_v0 = vadd.f32 %v3583_v59, %v1083_v45  ;;  %2786 = vrsqrt.f32 %v697_v58  ;;  %vm789_vm3 = vweird.f32 %v697_v58 }
 0x181   : > { %v577_v14 = vmul.f32 %v3653_v28, %v3653_v28  ;;  %1929 = vmatpush.bf16.msra.mxu2 %v2504_v26 }
 0x182   : > { %v1149_v43 = vpack.c.bf16 %v1120_v29, %v1119_v0 }
 0x183   : > { %468 = vadd.xlane.f32.xlu0 %v3655_v15  ;;  %623 = vadd.xlane.f32.xlu1 %v577_v14  ;;  %v2512_v14 = vld [vmem:[#allocation8 + $0x68] sm:$0xff] }
 0x184   : > { %464 = vadd.xlane.f32.xlu2 %v3657_v18  ;;  %1278 = vmatmul.bf16.gmra.mxu0 %v1148_v44 }
 0x185   : > { %1367 = vmatmul.bf16.gmra.mxu1 %v1148_v44  ;;  %2018 = vmatpush.bf16.msra.mxu3 %v2512_v14 }
 0x186   : > { %v2787_v16 = vpop.eup %2786  ;;  %1930 = vmatpush.bf16.msra.mxu2 %v2503_v33 }
 0x187   : > { %v784_v60 = vmul.f32 %v2787_v16, %v697_v58  ;;  %vm790_vm4 = vweird.f32 %v2787_v16 }
 0x188   : > { %vm3694_vm5 = vmor %vm789_vm3, %vm790_vm4 }
 0x189   : > { %v785_v51 = vmul.f32 %v2787_v16, %v784_v60  ;;  %2019 = vmatpush.bf16.msra.mxu3 %v2511_v56  ;;  %v2502_v60 = vld [vmem:[#allocation8 + $0x18] sm:$0xff]  ;;  %v2501_v56 = vld [vmem:[#allocation8 + $0x10] sm:$0xff] }
 0x18a   : > { %1931 = vmatpush.bf16.msra.mxu2 %v2502_v60 }
 0x18b   : > { %470 = vadd.xlane.f32.xlu1 %v3672_v34  ;;  %v786_v25 = vmul.f32 0.5, %v785_v51 }
 0x18d   : > { %v787_v44 = vsub.f32 1.5, %v786_v25 }
 0x18e   : > { %1932 = vmatpush.bf16.msra.mxu2 %v2501_v56  ;;  %v2499_v56 = vld [vmem:[#allocation8] sm:$0xff] }
 0x18f   : > { %v788_v45 = vmul.f32 %v2787_v16, %v787_v44 }
 0x191   : > { %v792_v37 = vsel %vm3694_vm5, %v2787_v16, %v788_v45 }
 0x192   : > { %v1049_v44 = vmul.f32 %v792_v37, %v3477_v50 }
 0x193   : > { %472 = vadd.xlane.f32.xlu1 %v3683_v42 }
 0x194   : > { %1283 = vmatmul.bf16.gmra.mxu0 %v1149_v43 }
 0x195   : > { %1372 = vmatmul.bf16.gmra.mxu1 %v1149_v43 }
 0x1ce   : > { %v610_v61 = vpop.xlane.xlu1 %609 }
 0x1cf   : > { %v666_v9 = vmul.f32 %v610_v61, %v3424_v17  ;;  %v2510_v61 = vld [vmem:[#allocation8 + $0x58] sm:$0xff] }
 0x1d0   : > { %2020 = vmatpush.bf16.msra.mxu3 %v2510_v61  ;;  %v2500_v61 = vld [vmem:[#allocation8 + $0x8] sm:$0xff] }
 0x1d1   : > { %v698_v12 = vadd.f32 1e-05, %v666_v9  ;;  %1933 = vmatpush.bf16.msra.mxu2 %v2500_v61 }
 0x1d3   : > { %2788 = vrsqrt.f32 %v698_v12  ;;  %vm799_vm7 = vweird.f32 %v698_v12 }
 0x1d5   : > { %1934 = vmatpush.bf16.msra.mxu2 %v2499_v56 }
 0x1d6   : > { %v612_v39 = vpop.xlane.xlu1 %611 }
 0x1d7   : > { %v667_v19 = vmul.f32 %v612_v39, %v3424_v17 }
 0x1d9   : > { %v2789_v24 = vpop.eup %2788  ;;  %v3691_v31 = vadd.f32 1e-05, %v667_v19 }
 0x1da   : > { %v794_v11 = vmul.f32 %v2789_v24, %v698_v12  ;;  %vm800_vm6 = vweird.f32 %v2789_v24 }
 0x1db   : > { %2790 = vrsqrt.f32 %v3691_v31  ;;  %vm801_vm8 = vmor %vm799_vm7, %vm800_vm6  ;;  %vm809_vm10 = vweird.f32 %v3691_v31 }
 0x1dc   : > { %v795_v35 = vmul.f32 %v2789_v24, %v794_v11 }
 0x1de   : > { %v796_v0 = vmul.f32 0.5, %v795_v35  ;;  %v618_v36 = vpop.xlane.xlu0 %617  ;;  %v459_v38 = vpop.xlane.xlu1 %458  ;;  %v2509_v35 = vld [vmem:[#allocation8 + $0x50] sm:$0xff] }
 0x1df   : > { %v614_v43 = vpop.xlane.xlu2 %613  ;;  %v670_v62 = vmul.f32 %v618_v36, %v3424_v17  ;;  %v514_v51 = vmul.f32 %v3424_v17, %v459_v38  ;;  %v1085_v36 = vmul.f32 %v3565_v32, %v1049_v44  ;;  %2021 = vmatpush.bf16.msra.mxu3 %v2509_v35  ;;  %v2507_v35 = vld [vmem:[#allocation8 + $0x40] sm:$0xff] }
 0x1e0   : > { %v797_v9 = vsub.f32 1.5, %v796_v0  ;;  %v668_v58 = vmul.f32 %v614_v43, %v3424_v17 }
 0x1e1   : > { %v3703_v20 = vpop.eup %2790  ;;  %v3707_v26 = vadd.f32 1e-05, %v670_v62  ;;  %v3712_v19 = vsub.f32 %v3557_v27, %v514_v51  ;;  %v1121_v44 = vadd.f32 %v3583_v59, %v1085_v36 }
 0x1e2   : > { %v798_v25 = vmul.f32 %v2789_v24, %v797_v9  ;;  %v3705_v39 = vadd.f32 1e-05, %v668_v58  ;;  %v804_v14 = vmul.f32 %v3703_v20, %v3691_v31  ;;  %v2508_v9 = vld [vmem:[#allocation8 + $0x48] sm:$0xff]  ;;  %vm810_vm9 = vweird.f32 %v3703_v20 }
 0x1e3   : > { %v578_v12 = vmul.f32 %v3712_v19, %v3712_v19  ;;  %2022 = vmatpush.bf16.msra.mxu3 %v2508_v9  ;;  %vm3762_vm11 = vmor %vm809_vm10, %vm810_vm9  ;;  %vm839_vm15 = vweird.f32 %v3707_v26 }
 0x1e4   : > { %2792 = vrsqrt.f32 %v3705_v39  ;;  %v802_v16 = vsel %vm801_vm8, %v2789_v24, %v798_v25  ;;  %v805_v11 = vmul.f32 %v3703_v20, %v804_v14  ;;  %vm819_vm12 = vweird.f32 %v3705_v39 }
 0x1e5   : > { %2794 = vrsqrt.f32 %v3707_v26  ;;  %v1050_v33 = vmul.f32 %v802_v16, %v3506_v22  ;;  %625 = vadd.xlane.f32.xlu2 %v578_v12 }
 0x1e6   : > { %v806_v45 = vmul.f32 0.5, %v805_v11  ;;  %v620_v0 = vpop.xlane.xlu0 %619  ;;  %v461_v24 = vpop.xlane.xlu1 %460  ;;  %v1179_v11 = vld [vmem:[%s4707_s4] sm:$0x3] }
 0x1e7   : > { %v616_v29 = vpop.xlane.xlu2 %615  ;;  %v1086_v43 = vmul.f32 %v3565_v32, %v1050_v33  ;;  %v515_v60 = vmul.f32 %v3424_v17, %v461_v24  ;;  %v671_v14 = vmul.f32 %v620_v0, %v3424_v17  ;;  %v3752_v36 = vperm.slane %v1179_v11, 0  ;;  %2023 = vmatpush.bf16.msra.mxu3 %v2507_v35 }
 0x1e8   : > { %v669_v50 = vmul.f32 %v616_v29, %v3424_v17  ;;  %v807_v58 = vsub.f32 1.5, %v806_v45 }
 0x1e9   : > { %v1122_v62 = vadd.f32 %v3583_v59, %v1086_v43  ;;  %v3735_v25 = vsub.f32 %v3597_v2, %v515_v60  ;;  %v3750_v43 = vadd.f32 1e-05, %v671_v14  ;;  %v3754_v60 = vperm.slane %v1179_v11, 1 }
 0x1ea   : > { %v3725_v22 = vpop.eup %2792  ;;  %v3727_v38 = vadd.f32 1e-05, %v669_v50  ;;  %v808_v45 = vmul.f32 %v3703_v20, %v807_v58 }
 0x1eb   : > { %v3730_v51 = vpop.eup %2794  ;;  %v814_v37 = vmul.f32 %v3725_v22, %v3705_v39  ;;  %v579_v33 = vmul.f32 %v3735_v25, %v3735_v25  ;;  %v1150_v29 = vpack.c.bf16 %v1122_v62, %v1121_v44  ;;  %vm820_vm13 = vweird.f32 %v3725_v22 }
 0x1ec   : > { %v834_v16 = vmul.f32 %v3730_v51, %v3707_v26  ;;  %2796 = vrsqrt.f32 %v3727_v38  ;;  %vm3791_vm14 = vmor %vm819_vm12, %vm820_vm13  ;;  %vm840_vm0 = vweird.f32 %v3730_v51  ;;  %vm829_vm1 = vweird.f32 %v3727_v38  ;;  %v2672_v26 = vld [vmem:[%s3385_s16 + $0x68] sm:$0xff]  }
 0x1ed   : > { %v815_v12 = vmul.f32 %v3725_v22, %v814_v37  ;;  %627 = vadd.xlane.f32.xlu2 %v579_v33  ;;  %1288 = vmatmul.bf16.gmra.mxu0 %v1150_v29  ;;  %v812_v33 = vsel %vm3762_vm11, %v3703_v20, %v808_v45  ;;  %2798 = vrsqrt.f32 %v3750_v43  ;;  %vm3869_vm4 = vmor %vm839_vm15, %vm840_vm0  ;;  %vm849_vm5 = vweird.f32 %v3750_v43 }
 0x1ee   : > { %v467_v24 = vpop.xlane.xlu0 %466  ;;  %v835_v61 = vmul.f32 %v3730_v51, %v834_v16  ;;  %1377 = vmatmul.bf16.gmra.mxu1 %v1150_v29  ;;  %v622_v58 = vpop.xlane.xlu1 %621 }
 0x1ef   : > { %v816_v0 = vmul.f32 0.5, %v815_v12  ;;  %v463_v50 = vpop.xlane.xlu2 %462  ;;  %v518_v62 = vmul.f32 %v3424_v17, %v467_v24  ;;  %v672_v31 = vmul.f32 %v622_v58, %v3424_v17  ;;  %v3778_v12 = vunpack.c.h.bf16 %v3679_v21  ;;  %v3804_v58 = vld [vmem:[%s3385_s16 + $0x60] sm:$0xff]  }
 0x1f0   : > { %v516_v9 = vmul.f32 %v3424_v17, %v463_v50  ;;  %v836_v24 = vmul.f32 0.5, %v835_v61 }
 0x1f1   : > { %v817_v14 = vsub.f32 1.5, %v816_v0  ;;  %v3775_v11 = vsub.f32 %v3636_v48, %v518_v62  ;;  %4784 = vst [vmem:[#allocation33_spill] sm:$0xff] %v3778_v12  ;;  %v3787_v29 = vadd.f32 1e-05, %v672_v31  ;;  %v1274_v0 = vpop.f32.mrf.mxu0  ;;  %v1051_v62 = vmul.f32 %v812_v33, %v3516_v41 }
 0x1f2   : > { %v3769_v16 = vpop.eup %2796  ;;  %v3772_v44 = vsub.f32 %v3638_v53, %v516_v9  ;;  %v1363_v50 = vpop.f32.mrf.mxu1  ;;  %v3796_v20 = vadd.f32 %v1274_v0, %v3752_v36  ;;  %v837_v41 = vsub.f32 1.5, %v836_v24 }
 0x1f3   : > { %v818_v56 = vmul.f32 %v3725_v22, %v817_v14  ;;  %v824_v35 = vmul.f32 %v3769_v16, %v3727_v38  ;;  %2800 = vrsqrt.f32 %v3787_v29  ;;  %v3801_v9 = vadd.f32 %v1363_v50, %v3754_v60  ;;  %v3824_v2 = vpop.eup %2798 }
 0x1f4   : > { %v1443_v39 = vmul.f32 0.5, %v3796_v20  ;;  %v580_v37 = vmul.f32 %v3772_v44, %v3772_v44  ;;  %v582_v61 = vmul.f32 %v3775_v11, %v3775_v11  ;;  %vm830_vm2 = vweird.f32 %v3769_v16 }
 0x1f5   : > { %v825_v45 = vmul.f32 %v3769_v16, %v824_v35  ;;  %v1444_v31 = vmul.f32 0.5, %v3801_v9  ;;  %474 = vadd.xlane.f32.xlu2 %v3778_v12  ;;  %v822_v50 = vsel %vm3791_vm14, %v3725_v22, %v818_v56  ;;  %v1087_v22 = vmul.f32 %v3565_v32, %v1051_v62  ;;  %vm3856_vm3 = vmor %vm829_vm1, %vm830_vm2 }
 0x1f6   : > { %v469_v0 = vpop.xlane.xlu0 %468  ;;  %629 = vadd.xlane.f32.xlu0 %v580_v37  ;;  %633 = vadd.xlane.f32.xlu1 %v582_v61  ;;  %v3818_v48 = vpop.xlane.xlu1 %623  ;;  %2802 = vtanh.f32 %v1443_v39  ;;  %v1052_v57 = vmul.f32 %v822_v50, %v3551_v23  ;;  %v838_v37 = vmul.f32 %v3730_v51, %v837_v41  ;;  %v844_v61 = vmul.f32 %v3824_v2, %v3750_v43 }
 0x1f7   : > { %v826_v14 = vmul.f32 0.5, %v825_v45  ;;  %v465_v35 = vpop.xlane.xlu2 %464  ;;  %v519_v53 = vmul.f32 %v3424_v17, %v469_v0  ;;  %v3822_v45 = vunpack.c.l.bf16 %v3804_v58  ;;  %2804 = vtanh.f32 %v1444_v31 }
 0x1f8   : > { %v517_v33 = vmul.f32 %v3424_v17, %v465_v35  ;;  %v1088_v62 = vmul.f32 %v3565_v32, %v1052_v57  ;;  %v1123_v57 = vadd.f32 %v3583_v59, %v1087_v22  ;;  %v3890_v0 = vunpack.c.h.bf16 %v2672_v26 }
 0x1f9   : > { %4787 = vst [vmem:[#allocation34_spill] sm:$0xff] %v3822_v45  ;;  %v827_v27 = vsub.f32 1.5, %v826_v14  ;;  %v3833_v21 = vsub.f32 %v3655_v15, %v519_v53  ;;  %v3835_v24 = vpop.eup %2800  ;;  %v1276_v23 = vpop.f32.mrf.mxu0  ;;  %v845_v15 = vmul.f32 %v3824_v2, %v844_v61  ;;  %v842_v61 = vsel %vm3869_vm4, %v3730_v51, %v838_v37 }
 0x1fa   : > { %v3830_v56 = vsub.f32 %v3657_v18, %v517_v33  ;;  %v1365_v39 = vpop.f32.mrf.mxu1  ;;  %v854_v53 = vmul.f32 %v3835_v24, %v3787_v29  ;;  %v3847_v14 = vadd.f32 %v1276_v23, %v3752_v36  ;;  %v1124_v33 = vadd.f32 %v3583_v59, %v1088_v62  ;;  %4793 = vst [vmem:[#allocation36_spill] sm:$0xff] %v3890_v0 }
 0x1fb   : > { %v828_v31 = vmul.f32 %v3769_v16, %v827_v27  ;;  %v3851_v38 = vadd.f32 %v1365_v39, %v3754_v60  ;;  %v583_v27 = vmul.f32 %v3833_v21, %v3833_v21  ;;  %v1054_v51 = vmul.f32 %v842_v61, %v3537_v13 }
 0x1fc   : > { %v581_v35 = vmul.f32 %v3830_v56, %v3830_v56  ;;  %v855_v50 = vmul.f32 %v3835_v24, %v854_v53  ;;  %v1445_v41 = vmul.f32 0.5, %v3847_v14  ;;  %v2803_v23 = vpop.eup %2802  ;;  %v1151_v62 = vpack.c.bf16 %v1124_v33, %v1123_v57 }
 0x1fd   : > { %v1446_v39 = vmul.f32 0.5, %v3851_v38  ;;  %476 = vadd.xlane.f32.xlu2 %v3822_v45  ;;  %v2805_v53 = vpop.eup %2804  ;;  %v832_v52 = vsel %vm3856_vm3, %v3769_v16, %v828_v31  ;;  %v1571_v54 = vmul.f32 0.5, %v2803_v23  ;;  %v3903_v23 = vunpack.c.l.bf16 %v2672_v26 }
 0x1fe   : > { %2806 = vtanh.f32 %v1445_v41  ;;  %631 = vadd.xlane.f32.xlu0 %v581_v35  ;;  %635 = vadd.xlane.f32.xlu1 %v583_v27  ;;  %v471_v18 = vpop.xlane.xlu1 %470  ;;  %v856_v46 = vmul.f32 0.5, %v855_v50  ;;  %v1572_v35 = vmul.f32 0.5, %v2805_v53  ;;  %v3888_v27 = vunpack.c.h.bf16 %v3804_v58 }
 0x1ff   : > { %2808 = vtanh.f32 %v1446_v39  ;;  %v520_v55 = vmul.f32 %v3424_v17, %v471_v18  ;;  %1293 = vmatmul.bf16.gmra.mxu0 %v1151_v62  ;;  %1382 = vmatmul.bf16.gmra.mxu1 %v1151_v62  ;;  %v846_v18 = vmul.f32 0.5, %v845_v15  ;;  %v1053_v16 = vmul.f32 %v832_v52, %v3595_v1  ;;  %4794 = vst [vmem:[#allocation37_spill] sm:$0xff] %v3903_v23 }
 0x200   : > { %4792 = vst [vmem:[#allocation35_spill] sm:$0xff] %v3888_v27  ;;  %v857_v15 = vsub.f32 1.5, %v856_v46  ;;  %v1635_v58 = vadd.f32 0.5, %v1571_v54  ;;  %v1636_v52 = vadd.f32 0.5, %v1572_v35  ;;  %vm859_vm6 = vweird.f32 %v3787_v29 }
 0x201   : > { %v3885_v57 = vsub.f32 %v3672_v34, %v520_v55  ;;  %v1279_v41 = vpop.f32.mrf.mxu0  ;;  %v847_v62 = vsub.f32 1.5, %v846_v18  ;;  %v1089_v13 = vmul.f32 %v3565_v32, %v1053_v16  ;;  %vm860_vm7 = vweird.f32 %v3835_v24 }
 0x202   : > { %v1368_v33 = vpop.f32.mrf.mxu1  ;;  %v3894_v31 = vadd.f32 %v1279_v41, %v3752_v36  ;;  %v1090_v35 = vmul.f32 %v3565_v32, %v1054_v51  ;;  %v858_v41 = vmul.f32 %v3835_v24, %v857_v15  ;;  %vm850_vm8 = vweird.f32 %v3824_v2  ;;  %vm3931_vm9 = vmor %vm859_vm6, %vm860_vm7 }
 0x203   : > { %v3897_v50 = vadd.f32 %v1368_v33, %v3754_v60  ;;  %v584_v55 = vmul.f32 %v3885_v57, %v3885_v57  ;;  %v1699_v33 = vmul.f32 %v1635_v58, %v3796_v20  ;;  %v1125_v20 = vadd.f32 %v3583_v59, %v1089_v13  ;;  %vm3943_vm10 = vmor %vm849_vm5, %vm850_vm8 }
 0x204   : > { %v2807_v37 = vpop.eup %2806  ;;  %v1447_v1 = vmul.f32 0.5, %v3894_v31 }
 0x205   : > { %v2809_v22 = vpop.eup %2808  ;;  %v1448_v39 = vmul.f32 0.5, %v3897_v50  ;;  %637 = vadd.xlane.f32.xlu2 %v584_v55  ;;  %v1573_v53 = vmul.f32 0.5, %v2807_v37  ;;  %v2673_v55 = vld [vmem:[%s3385_s16 + $0x70] sm:$0xff]   ;;  %v1700_v37 = vmul.f32 %v1636_v52, %v3801_v9 }
 0x206   : > { %478 = vadd.xlane.f32.xlu0 %v3888_v27  ;;  %482 = vadd.xlane.f32.xlu1 %v3890_v0  ;;  %v473_v46 = vpop.xlane.xlu1 %472  ;;  %v1574_v54 = vmul.f32 0.5, %v2809_v22  ;;  %2810 = vtanh.f32 %v1447_v1  ;;  %v3937_v52 = vunpack.c.l.bf16 %v2673_v55 }
 0x207   : > { %v521_v26 = vmul.f32 %v3424_v17, %v473_v46  ;;  %v1637_v61 = vadd.f32 0.5, %v1573_v53  ;;  %2812 = vtanh.f32 %v1448_v39  ;;  %v1126_v39 = vadd.f32 %v3583_v59, %v1090_v35 }
 0x208   : > { %v1638_v18 = vadd.f32 0.5, %v1574_v54  ;;  %4797 = vst [vmem:[#allocation38_spill] sm:$0xff] %v3937_v52  ;;  %v848_v54 = vmul.f32 %v3824_v2, %v847_v62 }
 0x209   : > { %v3919_v22 = vsub.f32 %v3683_v42, %v521_v26  ;;  %v1281_v16 = vpop.f32.mrf.mxu0  ;;  %v1701_v46 = vmul.f32 %v1637_v61, %v3847_v14  ;;  %v1152_v26 = vpack.c.bf16 %v1126_v39, %v1125_v20  ;;  %v862_v61 = vsel %vm3931_vm9, %v3835_v24, %v858_v41 }
 0x20a   : > { %v1370_v34 = vpop.f32.mrf.mxu1  ;;  %v1282_v53 = vadd.f32 %v1281_v16, %v3752_v36  ;;  %v1702_v15 = vmul.f32 %v1638_v18, %v3851_v38  ;;  %v3952_v18 = vunpack.c.h.bf16 %v2673_v55  ;;  %v1056_v16 = vmul.f32 %v862_v61, %v3631_v47 }
 0x20b   : > { %v1371_v51 = vadd.f32 %v1370_v34, %v3754_v60  ;;  %v1763_v58 = vpack.c.bf16 %v1701_v46, %v1699_v33  ;;  %v585_v14 = vmul.f32 %v3919_v22, %v3919_v22 }
 0x20c   : > { %v1449_v34 = vmul.f32 0.5, %v1282_v53  ;;  %v1764_v1 = vpack.c.bf16 %v1702_v15, %v1700_v37  ;;  %v2811_v29 = vpop.eup %2810  ;;  %4800 = vst [vmem:[#allocation39_spill] sm:$0xff] %v3952_v18  ;;  %v852_v37 = vsel %vm3943_vm10, %v3824_v2, %v848_v54  ;;  %v1092_v2 = vmul.f32 %v3565_v32, %v1056_v16 }
 0x20d   : > { %v1450_v38 = vmul.f32 0.5, %v1371_v51  ;;  %1935 = vmatmul.bf16.vlgmr.msra.gmra.mxu2 %v1763_v58  ;;  %639 = vadd.xlane.f32.xlu2 %v585_v14  ;;  %v2813_v35 = vpop.eup %2812  ;;  %v1575_v43 = vmul.f32 0.5, %v2811_v29  ;;  %v1055_v9 = vmul.f32 %v852_v37, %v3589_v63 }
 0x20e   : > { %2814 = vtanh.f32 %v1449_v34  ;;  %2024 = vmatmul.bf16.vlgmr.msra.gmra.mxu3 %v1764_v1  ;;  %480 = vadd.xlane.f32.xlu0 %v3903_v23  ;;  %v1576_v46 = vmul.f32 0.5, %v2813_v35 }
 0x20f   : > { %2816 = vtanh.f32 %v1450_v38  ;;  %484 = vadd.xlane.f32.xlu1 %v3937_v52  ;;  %1298 = vmatmul.bf16.gmra.mxu0 %v1152_v26  ;;  %v1639_v14 = vadd.f32 0.5, %v1575_v43  ;;  %v3963_v38 = vld [vmem:[%s3385_s16 + $0x78] sm:$0xff]   ;;  %v1091_v63 = vmul.f32 %v3565_v32, %v1055_v9  ;;  %v1128_v43 = vadd.f32 %v3583_v59, %v1092_v2 }
 0x210   : > { %1387 = vmatmul.bf16.gmra.mxu1 %v1152_v26  ;;  %v1640_v47 = vadd.f32 0.5, %v1576_v46  ;;  %v3967_v29 = vunpack.c.l.bf16 %v3963_v38 }
 0x211   : > { %v1284_v62 = vpop.f32.mrf.mxu0  ;;  %v1703_v13 = vmul.f32 %v1639_v14, %v3894_v31  ;;  %v1127_v32 = vadd.f32 %v3583_v59, %v1091_v63 }
 0x212   : > { %v1373_v33 = vpop.f32.mrf.mxu1  ;;  %v1285_v24 = vadd.f32 %v1284_v62, %v3752_v36  ;;  %v1704_v62 = vmul.f32 %v1640_v47, %v3897_v50 }
 0x213   : > { %v1374_v41 = vadd.f32 %v1373_v33, %v3754_v60 }
 0x214   : > { %v2815_v15 = vpop.eup %2814  ;;  %v1451_v20 = vmul.f32 0.5, %v1285_v24 }
 0x215   : > { %v2817_v58 = vpop.eup %2816  ;;  %v1452_v34 = vmul.f32 0.5, %v1374_v41  ;;  %486 = vadd.xlane.f32.xlu2 %v3952_v18  ;;  %v1577_v55 = vmul.f32 0.5, %v2815_v15 }
 0x216   : > { %v1578_v1 = vmul.f32 0.5, %v2817_v58  ;;  %2818 = vtanh.f32 %v1451_v20 }
 0x217   : > { %v1641_v39 = vadd.f32 0.5, %v1577_v55  ;;  %2820 = vtanh.f32 %v1452_v34 }
 0x218   : > { %v1642_v54 = vadd.f32 0.5, %v1578_v1 }
 0x219   : > { %v1286_v26 = vpop.f32.mrf.mxu0  ;;  %v1705_v35 = vmul.f32 %v1641_v39, %v1282_v53  ;;  %v1153_v53 = vpack.c.bf16 %v1128_v43, %v1127_v32  ;;  %v673_v43 = vmul.f32 %v3818_v48, %v3424_v17 }
 0x21a   : > { %v1375_v61 = vpop.f32.mrf.mxu1  ;;  %v1287_v33 = vadd.f32 %v1286_v26, %v3752_v36  ;;  %v1706_v16 = vmul.f32 %v1642_v54, %v1371_v51 }
 0x21b   : > { %v1376_v37 = vadd.f32 %v1375_v61, %v3754_v60  ;;  %v1765_v46 = vpack.c.bf16 %v1705_v35, %v1703_v13 }
 0x21c   : > { %v1453_v15 = vmul.f32 0.5, %v1287_v33  ;;  %v1766_v58 = vpack.c.bf16 %v1706_v16, %v1704_v62  ;;  %v2819_v31 = vpop.eup %2818  ;;  %v705_v62 = vadd.f32 1e-05, %v673_v43 }
 0x21d   : > { %v1454_v20 = vmul.f32 0.5, %v1376_v37  ;;  %1940 = vmatmul.bf16.gmra.mxu2 %v1765_v46  ;;  %488 = vadd.xlane.f32.xlu2 %v3967_v29  ;;  %v2821_v9 = vpop.eup %2820  ;;  %v1579_v50 = vmul.f32 0.5, %v2819_v31 }
 0x21e   : > { %2822 = vtanh.f32 %v1453_v15  ;;  %2029 = vmatmul.bf16.gmra.mxu3 %v1766_v58  ;;  %v1580_v14 = vmul.f32 0.5, %v2821_v9  ;;  %vm869_vm11 = vweird.f32 %v705_v62 }
 0x21f   : > { %2824 = vtanh.f32 %v1454_v20  ;;  %1303 = vmatmul.bf16.gmra.mxu0 %v1153_v53  ;;  %v1643_v55 = vadd.f32 0.5, %v1579_v50 }
 0x220   : > { %1392 = vmatmul.bf16.gmra.mxu1 %v1153_v53  ;;  %v1644_v47 = vadd.f32 0.5, %v1580_v14  ;;  %2826 = vrsqrt.f32 %v705_v62 }
 0x221   : > { %v1707_v54 = vmul.f32 %v1643_v55, %v1285_v24 }
 0x222   : > { %v1708_v13 = vmul.f32 %v1644_v47, %v1374_v41 }
 0x224   : > { %v2823_v51 = vpop.eup %2822 }
 0x225   : > { %v2825_v34 = vpop.eup %2824  ;;  %v1581_v2 = vmul.f32 0.5, %v2823_v51 }
 0x226   : > { %v1582_v1 = vmul.f32 0.5, %v2825_v34  ;;  %v2827_v16 = vpop.eup %2826 }
 0x227   : > { %v1645_v59 = vadd.f32 0.5, %v1581_v2  ;;  %v864_v46 = vmul.f32 %v2827_v16, %v705_v62  ;;  %vm870_vm12 = vweird.f32 %v2827_v16 }
 0x228   : > { %v1646_v39 = vadd.f32 0.5, %v1582_v1  ;;  %vm3984_vm13 = vmor %vm869_vm11, %vm870_vm12 }
 0x229   : > { %v1709_v63 = vmul.f32 %v1645_v59, %v1287_v33  ;;  %v865_v32 = vmul.f32 %v2827_v16, %v864_v46 }
 0x22a   : > { %v1710_v26 = vmul.f32 %v1646_v39, %v1376_v37 }
 0x22b   : > { %v1767_v61 = vpack.c.bf16 %v1709_v63, %v1707_v54  ;;  %v866_v24 = vmul.f32 0.5, %v865_v32 }
 0x22c   : > { %v1768_v35 = vpack.c.bf16 %v1710_v26, %v1708_v13 }
 0x22d   : > { %1945 = vmatmul.bf16.gmra.mxu2 %v1767_v61  ;;  %v867_v53 = vsub.f32 1.5, %v866_v24 }
 0x22e   : > { %2034 = vmatmul.bf16.gmra.mxu3 %v1768_v35 }
 0x22f   : > { %v868_v50 = vmul.f32 %v2827_v16, %v867_v53 }
 0x231   : > { %v872_v43 = vsel %vm3984_vm13, %v2827_v16, %v868_v50 }
 0x232   : > { %v1057_v16 = vmul.f32 %v872_v43, %v3653_v28 }
 0x258   : > { %v626_v15 = vpop.xlane.xlu2 %625 }
 0x259   : > { %v674_v20 = vmul.f32 %v626_v15, %v3424_v17 }
 0x25b   : > { %v706_v58 = vadd.f32 1e-05, %v674_v20 }
 0x25d   : > { %2828 = vrsqrt.f32 %v706_v58  ;;  %vm879_vm15 = vweird.f32 %v706_v58 }
 0x260   : > { %v628_v41 = vpop.xlane.xlu2 %627 }
 0x261   : > { %v675_v33 = vmul.f32 %v628_v41, %v3424_v17 }
 0x263   : > { %v2829_v37 = vpop.eup %2828  ;;  %v3981_v31 = vadd.f32 1e-05, %v675_v33 }
 0x264   : > { %v874_v9 = vmul.f32 %v2829_v37, %v706_v58  ;;  %vm880_vm14 = vweird.f32 %v2829_v37 }
 0x265   : > { %2830 = vrsqrt.f32 %v3981_v31  ;;  %vm881_vm0 = vmor %vm879_vm15, %vm880_vm14  ;;  %vm889_vm1 = vweird.f32 %v3981_v31 }
 0x266   : > { %v875_v48 = vmul.f32 %v2829_v37, %v874_v9 }
 0x268   : > { %v876_v14 = vmul.f32 0.5, %v875_v48  ;;  %v475_v51 = vpop.xlane.xlu2 %474 }
 0x269   : > { %v522_v55 = vmul.f32 %v3424_v17, %v475_v51  ;;  %v634_v2 = vpop.xlane.xlu1 %633  ;;  %v630_v47 = vpop.xlane.xlu0 %629 }
 0x26a   : > { %v877_v1 = vsub.f32 1.5, %v876_v14  ;;  %v678_v59 = vmul.f32 %v634_v2, %v3424_v17  ;;  %v676_v39 = vmul.f32 %v630_v47, %v3424_v17  ;;  %v1289_v13 = vpop.f32.mrf.mxu0 }
 0x26b   : > { %v3991_v54 = vpop.eup %2830  ;;  %v3994_v63 = vsub.f32 %v3778_v12, %v522_v55  ;;  %v1378_v26 = vpop.f32.mrf.mxu1  ;;  %v4005_v15 = vadd.f32 %v1289_v13, %v3752_v36  ;;  %v4024_v55 = vld [vmem:[#allocation5] ss:$0 sm:$0xff] }
 0x26c   : > { %v878_v61 = vmul.f32 %v2829_v37, %v877_v1  ;;  %v3996_v35 = vadd.f32 1e-05, %v678_v59  ;;  %v884_v62 = vmul.f32 %v3991_v54, %v3981_v31  ;;  %v4002_v46 = vadd.f32 1e-05, %v676_v39 }
 0x26d   : > { %v586_v20 = vmul.f32 %v3994_v63, %v3994_v63  ;;  %v4011_v58 = vadd.f32 %v1378_v26, %v3754_v60  ;;  %v1455_v24 = vmul.f32 0.5, %v4005_v15  ;;  %v1093_v2 = vmul.f32 %v4024_v55, %v1057_v16 }
 0x26e   : > { %2832 = vrsqrt.f32 %v3996_v35  ;;  %v882_v32 = vsel %vm881_vm0, %v2829_v37, %v878_v61  ;;  %v885_v53 = vmul.f32 %v3991_v54, %v884_v62  ;;  %vm890_vm2 = vweird.f32 %v3991_v54 }
 0x26f   : > { %2834 = vrsqrt.f32 %v4002_v46  ;;  %641 = vadd.xlane.f32.xlu0 %v586_v20  ;;  %v1058_v33 = vmul.f32 %v882_v32, %v3712_v19  ;;  %v1456_v14 = vmul.f32 0.5, %v4011_v58  ;;  %vm899_vm3 = vweird.f32 %v4002_v46  ;;  %vm4112_vm5 = vmor %vm889_vm1, %vm890_vm2 }
 0x270   : > { %v477_v41 = vpop.xlane.xlu2 %476  ;;  %2836 = vtanh.f32 %v1455_v24  ;;  %v886_v13 = vmul.f32 0.5, %v885_v53  ;;  %v4053_v24 = vld [vmem:[%s4705_s2] ss:$0 sm:$0xff]  ;;  %vm919_vm6 = vweird.f32 %v3996_v35 }
 0x271   : > { %v523_v9 = vmul.f32 %v3424_v17, %v477_v41  ;;  %v636_v48 = vpop.xlane.xlu1 %635  ;;  %v632_v50 = vpop.xlane.xlu0 %631  ;;  %v1094_v59 = vmul.f32 %v4024_v55, %v1058_v33  ;;  %2838 = vtanh.f32 %v1456_v14  ;;  %v1129_v41 = vadd.f32 %v4053_v24, %v1093_v2 }
 0x272   : > { %v677_v37 = vmul.f32 %v632_v50, %v3424_v17  ;;  %v1291_v34 = vpop.f32.mrf.mxu0  ;;  %v4062_v2 = vunpack.c.h.bf16 %v3963_v38 }
 0x273   : > { %v4022_v51 = vsub.f32 %v3822_v45, %v523_v9  ;;  %v1380_v28 = vpop.f32.mrf.mxu1  ;;  %v4032_v1 = vadd.f32 %v1291_v34, %v3752_v36  ;;  %v1130_v33 = vadd.f32 %v4053_v24, %v1094_v59  ;;  %v887_v9 = vsub.f32 1.5, %v886_v13 }
 0x274   : > { %v4027_v19 = vpop.eup %2832  ;;  %v4029_v47 = vadd.f32 1e-05, %v677_v37  ;;  %v4038_v26 = vadd.f32 %v1380_v28, %v3754_v60  ;;  %v679_v34 = vmul.f32 %v636_v48, %v3424_v17 }
 0x275   : > { %v4035_v39 = vpop.eup %2834  ;;  %v587_v61 = vmul.f32 %v4022_v51, %v4022_v51  ;;  %v914_v62 = vmul.f32 %v4027_v19, %v3996_v35  ;;  %v1457_v20 = vmul.f32 0.5, %v4032_v1  ;;  %v1154_v28 = vpack.c.bf16 %v1130_v33, %v1129_v41 }
 0x276   : > { %v894_v43 = vmul.f32 %v4035_v39, %v4002_v46  ;;  %2840 = vrsqrt.f32 %v4029_v47  ;;  %v1458_v16 = vmul.f32 0.5, %v4038_v26  ;;  %v2837_v37 = vpop.eup %2836  ;;  %v4069_v41 = vmul.f32 %v3991_v54, %v887_v9 }
 0x277   : > { %643 = vadd.xlane.f32.xlu0 %v587_v61  ;;  %2842 = vtanh.f32 %v1457_v20  ;;  %v2839_v59 = vpop.eup %2838  ;;  %1308 = vmatmul.bf16.gmra.mxu0 %v1154_v28  ;;  %vm900_vm4 = vweird.f32 %v4035_v39  ;;  %v4074_v33 = vadd.f32 1e-05, %v679_v34  ;;  %vm909_vm8 = vweird.f32 %v4029_v47 }
 0x278   : > { %v895_v32 = vmul.f32 %v4035_v39, %v894_v43  ;;  %v638_v53 = vpop.xlane.xlu2 %637  ;;  %v915_v43 = vmul.f32 %v4027_v19, %v914_v62  ;;  %2844 = vtanh.f32 %v1458_v16  ;;  %1397 = vmatmul.bf16.gmra.mxu1 %v1154_v28  ;;  %v1583_v62 = vmul.f32 0.5, %v2837_v37  ;;  %vm4123_vm7 = vmor %vm899_vm3, %vm900_vm4 }
 0x279   : > { %v483_v50 = vpop.xlane.xlu1 %482  ;;  %v479_v14 = vpop.xlane.xlu0 %478  ;;  %v680_v61 = vmul.f32 %v638_v53, %v3424_v17  ;;  %v1584_v9 = vmul.f32 0.5, %v2839_v59  ;;  %vm920_vm10 = vweird.f32 %v4027_v19  ;;  %vm929_vm15 = vweird.f32 %v4074_v33 }
 0x27a   : > { %v526_v45 = vmul.f32 %v3424_v17, %v483_v50  ;;  %v896_v13 = vmul.f32 0.5, %v895_v32  ;;  %v524_v20 = vmul.f32 %v3424_v17, %v479_v14  ;;  %v4080_v14 = vmul.f32 0.5, %v915_v43  ;;  %vm4191_vm12 = vmor %vm919_vm6, %vm920_vm10 }
 0x27b   : > { %v4078_v53 = vadd.f32 1e-05, %v680_v61  ;;  %v1647_v59 = vadd.f32 0.5, %v1583_v62  ;;  %v1648_v40 = vadd.f32 0.5, %v1584_v9 }
 0x27c   : > { %v4066_v48 = vpop.eup %2840  ;;  %v1294_v38 = vpop.f32.mrf.mxu0  ;;  %v4083_v28 = vsub.f32 %v3890_v0, %v526_v45  ;;  %v4086_v37 = vsub.f32 %v3888_v27, %v524_v20  ;;  %v897_v12 = vsub.f32 1.5, %v896_v13 }
 0x27d   : > { %v1383_v16 = vpop.f32.mrf.mxu1  ;;  %v904_v32 = vmul.f32 %v4066_v48, %v4029_v47  ;;  %v2843_v50 = vpop.eup %2842  ;;  %v4090_v34 = vadd.f32 %v1294_v38, %v3752_v36  ;;  %2846 = vrsqrt.f32 %v4078_v53  ;;  %vm910_vm9 = vweird.f32 %v4066_v48 }
 0x27e   : > { %4803 = vst [vmem:[#allocation40_spill] sm:$0xff] %v4083_v28  ;;  %v4093_v42 = vadd.f32 %v1383_v16, %v3754_v60  ;;  %v1585_v43 = vmul.f32 0.5, %v2843_v50  ;;  %v2845_v49 = vpop.eup %2844  ;;  %v590_v20 = vmul.f32 %v4083_v28, %v4083_v28  ;;  %v588_v0 = vmul.f32 %v4086_v37, %v4086_v37  ;;  %vm4178_vm11 = vmor %vm909_vm8, %vm910_vm9 }
 0x27f   : > { %490 = vadd.xlane.f32.xlu0 %v4062_v2  ;;  %v905_v45 = vmul.f32 %v4066_v48, %v904_v32  ;;  %v1459_v38 = vmul.f32 0.5, %v4090_v34  ;;  %2848 = vrsqrt.f32 %v4074_v33  ;;  %v1586_v9 = vmul.f32 0.5, %v2845_v49 }
 0x280   : > { %v4095_v61 = vpop.xlane.xlu2 %639  ;;  %v1460_v16 = vmul.f32 0.5, %v4093_v42  ;;  %649 = vadd.xlane.f32.xlu2 %v590_v20  ;;  %645 = vadd.xlane.f32.xlu1 %v588_v0  ;;  %v1649_v32 = vadd.f32 0.5, %v1585_v43  ;;  %v917_v20 = vsub.f32 1.5, %v4080_v14  ;;  %v892_v49 = vsel %vm4112_vm5, %v3991_v54, %v4069_v41 }
 0x281   : > { %v481_v13 = vpop.xlane.xlu0 %480  ;;  %2850 = vtanh.f32 %v1459_v38  ;;  %v906_v0 = vmul.f32 0.5, %v905_v45  ;;  %v1712_v45 = vmul.f32 %v1648_v40, %v4011_v58  ;;  %v1059_v40 = vmul.f32 %v892_v49, %v3735_v25 }
 0x282   : > { %v485_v27 = vpop.xlane.xlu1 %484  ;;  %v525_v50 = vmul.f32 %v3424_v17, %v481_v13  ;;  %v898_v13 = vmul.f32 %v4035_v39, %v897_v12  ;;  %v1711_v12 = vmul.f32 %v1647_v59, %v4005_v15  ;;  %2852 = vtanh.f32 %v1460_v16 }
 0x283   : > { %v527_v62 = vmul.f32 %v3424_v17, %v485_v27  ;;  %v1713_v28 = vmul.f32 %v1649_v32, %v4032_v1  ;;  %v4147_v54 = vpop.eup %2846  ;;  %v1650_v15 = vadd.f32 0.5, %v1586_v9  ;;  %v1095_v27 = vmul.f32 %v4024_v55, %v1059_v40 }
 0x284   : > { %v1296_v31 = vpop.f32.mrf.mxu0  ;;  %v4137_v46 = vsub.f32 %v3903_v23, %v525_v50  ;;  %v902_v59 = vsel %vm4123_vm7, %v4035_v39, %v898_v13  ;;  %v907_v50 = vsub.f32 1.5, %v906_v0  ;;  %v934_v39 = vmul.f32 %v4147_v54, %v4078_v53 }
 0x285   : > { %v1385_v43 = vpop.f32.mrf.mxu1  ;;  %v4134_v14 = vsub.f32 %v3937_v52, %v527_v62  ;;  %v4141_v38 = vadd.f32 %v1296_v31, %v3752_v36  ;;  %v4155_v16 = vpop.eup %2848  ;;  %v1769_v32 = vpack.c.bf16 %v1713_v28, %v1711_v12  ;;  %v1714_v9 = vmul.f32 %v1650_v15, %v4038_v26 }
 0x286   : > { %v4144_v30 = vadd.f32 %v1385_v43, %v3754_v60  ;;  %v1060_v43 = vmul.f32 %v902_v59, %v3772_v44  ;;  %v589_v25 = vmul.f32 %v4137_v46, %v4137_v46  ;;  %v918_v49 = vmul.f32 %v4027_v19, %v917_v20 }
 0x287   : > { %4808 = vst [vmem:[#allocation41_spill] sm:$0xff] %v4134_v14  ;;  %v591_v41 = vmul.f32 %v4134_v14, %v4134_v14  ;;  %v1461_v62 = vmul.f32 0.5, %v4141_v38  ;;  %v2851_v31 = vpop.eup %2850  ;;  %1950 = vmatmul.bf16.gmra.mxu2 %v1769_v32  ;;  %v1770_v26 = vpack.c.bf16 %v1714_v9, %v1712_v45  ;;  %v908_v12 = vmul.f32 %v4066_v48, %v907_v50 }
 0x288   : > { %v487_v58 = vpop.xlane.xlu2 %486  ;;  %v1462_v1 = vmul.f32 0.5, %v4144_v30  ;;  %v2853_v0 = vpop.eup %2852  ;;  %v1096_v44 = vmul.f32 %v4024_v55, %v1060_v43  ;;  %647 = vadd.xlane.f32.xlu1 %v589_v25  ;;  %v1587_v28 = vmul.f32 0.5, %v2851_v31  ;;  %v924_v59 = vmul.f32 %v4155_v16, %v4074_v33 }
 0x289   : > { %651 = vadd.xlane.f32.xlu0 %v591_v41  ;;  %2854 = vtanh.f32 %v1461_v62  ;;  %v528_v13 = vmul.f32 %v3424_v17, %v487_v58  ;;  %2039 = vmatmul.bf16.gmra.mxu3 %v1770_v26  ;;  %v1131_v45 = vadd.f32 %v4053_v24, %v1095_v27  ;;  %v935_v47 = vmul.f32 %v4147_v54, %v934_v39  ;;  %v4208_v39 = vld [vmem:[%s4709_s6] ss:$0 sm:$0xff] }
 0x28a   : > { %2856 = vtanh.f32 %v1462_v1  ;;  %v1132_v20 = vadd.f32 %v4053_v24, %v1096_v44  ;;  %v1588_v62 = vmul.f32 0.5, %v2853_v0  ;;  %v1651_v25 = vadd.f32 0.5, %v1587_v28 }
 0x28b   : > { %v4185_v58 = vsub.f32 %v3952_v18, %v528_v13  ;;  %v912_v26 = vsel %vm4178_vm11, %v4066_v48, %v908_v12  ;;  %vm939_vm13 = vweird.f32 %v4078_v53  ;;  %vm940_vm14 = vweird.f32 %v4147_v54 }
 0x28c   : > { %v1299_v15 = vpop.f32.mrf.mxu0  ;;  %v1155_v31 = vpack.c.bf16 %v1132_v20, %v1131_v45  ;;  %v922_v45 = vsel %vm4191_vm12, %v4027_v19, %v918_v49  ;;  %v936_v20 = vmul.f32 0.5, %v935_v47  ;;  %v1652_v18 = vadd.f32 0.5, %v1588_v62  ;;  %vm4252_vm1 = vmor %vm939_vm13, %vm940_vm14 }
 0x28d   : > { %v1388_v41 = vpop.f32.mrf.mxu1  ;;  %v4197_v1 = vadd.f32 %v1299_v15, %v3752_v36  ;;  %v592_v43 = vmul.f32 %v4185_v58, %v4185_v58  ;;  %v925_v15 = vmul.f32 %v4155_v16, %v924_v59  ;;  %v1061_v12 = vmul.f32 %v912_v26, %v3830_v56 }
 0x28e   : > { %v4200_v32 = vadd.f32 %v1388_v41, %v3754_v60  ;;  %1313 = vmatmul.bf16.gmra.mxu0 %v1155_v31  ;;  %1402 = vmatmul.bf16.gmra.mxu1 %v1155_v31  ;;  %v1715_v59 = vmul.f32 %v1651_v25, %v4090_v34  ;;  %v1062_v49 = vmul.f32 %v922_v45, %v3775_v11  ;;  %v937_v25 = vsub.f32 1.5, %v936_v20 }
 0x28f   : > { %v2855_v35 = vpop.eup %2854  ;;  %v1463_v13 = vmul.f32 0.5, %v4197_v1  ;;  %vm930_vm0 = vweird.f32 %v4155_v16 }
 0x290   : > { %v1936_v9 = vpop.f32.mrf.mxu2  ;;  %v489_v27 = vpop.xlane.xlu2 %488  ;;  %v1589_v41 = vmul.f32 0.5, %v2855_v35  ;;  %v1464_v23 = vmul.f32 0.5, %v4200_v32  ;;  %653 = vadd.xlane.f32.xlu1 %v592_v43  ;;  %v1097_v35 = vmul.f32 %v4024_v55, %v1061_v12  ;;  %vm4268_vm2 = vmor %vm929_vm15, %vm930_vm0 }
 0x291   : > { %v2025_v0 = vpop.f32.mrf.mxu3  ;;  %v2857_v44 = vpop.eup %2856  ;;  %v529_v28 = vmul.f32 %v3424_v17, %v489_v27  ;;  %2858 = vtanh.f32 %v1463_v13  ;;  %v1937_v31 = vadd.f32 %v4208_v39, %v1936_v9  ;;  %v926_v27 = vmul.f32 0.5, %v925_v15 }
 0x292   : > { %v1590_v52 = vmul.f32 0.5, %v2857_v44  ;;  %v1653_v14 = vadd.f32 0.5, %v1589_v41  ;;  %2860 = vtanh.f32 %v1464_v23 }
 0x293   : > { %v4220_v48 = vsub.f32 %v3967_v29, %v529_v28  ;;  %v2026_v13 = vadd.f32 %v2025_v0, %v1937_v31  ;;  %v927_v23 = vsub.f32 1.5, %v926_v27  ;;  %v1133_v0 = vadd.f32 %v4053_v24, %v1097_v35 }
 0x294   : > { %v1654_v40 = vadd.f32 0.5, %v1590_v52  ;;  %v1301_v50 = vpop.f32.mrf.mxu0  ;;  %v1717_v47 = vmul.f32 %v1653_v14, %v4141_v38  ;;  %v1716_v52 = vmul.f32 %v1652_v18, %v4093_v42  ;;  %v1098_v42 = vmul.f32 %v4024_v55, %v1062_v49 }
 0x295   : > { %v1390_v19 = vpop.f32.mrf.mxu1  ;;  %v4228_v62 = vadd.f32 %v1301_v50, %v3752_v36  ;;  %v593_v56 = vmul.f32 %v4220_v48, %v4220_v48  ;;  %v938_v28 = vmul.f32 %v4147_v54, %v937_v25  ;;  %v2105_v20 = vadd.f32 %v3404_v4, %v2026_v13 }
 0x296   : > { %v4231_v43 = vadd.f32 %v1390_v19, %v3754_v60  ;;  %v1718_v34 = vmul.f32 %v1654_v40, %v4144_v30  ;;  %v1771_v14 = vpack.c.bf16 %v1717_v47, %v1715_v59  ;;  %v1134_v50 = vadd.f32 %v4053_v24, %v1098_v42 }
 0x297   : > { %v1465_v9 = vmul.f32 0.5, %v4228_v62  ;;  %655 = vadd.xlane.f32.xlu2 %v593_v56  ;;  %v2859_v15 = vpop.eup %2858  ;;  %v928_v49 = vmul.f32 %v4155_v16, %v927_v23  ;;  %v942_v33 = vsel %vm4252_vm1, %v4147_v54, %v938_v28 }
 0x298   : > { %v1466_v11 = vmul.f32 0.5, %v4231_v43  ;;  %v1938_v38 = vpop.f32.mrf.mxu2  ;;  %v1772_v30 = vpack.c.bf16 %v1718_v34, %v1716_v52  ;;  %1955 = vmatmul.bf16.gmra.mxu2 %v1771_v14  ;;  %v2861_v41 = vpop.eup %2860  ;;  %v1591_v45 = vmul.f32 0.5, %v2859_v15  ;;  %v1156_v27 = vpack.c.bf16 %v1134_v50, %v1133_v0 }
 0x299   : > { %v1939_v26 = vadd.f32 %v4208_v39, %v1938_v38  ;;  %v2027_v44 = vpop.f32.mrf.mxu3  ;;  %2862 = vtanh.f32 %v1465_v9  ;;  %v1592_v56 = vmul.f32 0.5, %v2861_v41 }
 0x29a   : > { %2864 = vtanh.f32 %v1466_v11  ;;  %2044 = vmatmul.bf16.gmra.mxu3 %v1772_v30  ;;  %v1655_v11 = vadd.f32 0.5, %v1591_v45  ;;  %v1064_v30 = vmul.f32 %v942_v33, %v3885_v57 }
 0x29b   : > { %v2028_v18 = vadd.f32 %v2027_v44, %v1939_v26  ;;  %v932_v26 = vsel %vm4268_vm2, %v4155_v16, %v928_v49  ;;  %v1656_v44 = vadd.f32 0.5, %v1592_v56 }
 0x29c   : > { %v1304_v59 = vpop.f32.mrf.mxu0  ;;  %v1719_v42 = vmul.f32 %v1655_v11, %v4197_v1  ;;  %v1063_v16 = vmul.f32 %v932_v26, %v3833_v21 }
 0x29d   : > { %v2106_v12 = vadd.f32 %v3413_v7, %v2028_v18  ;;  %v1393_v40 = vpop.f32.mrf.mxu1  ;;  %v4258_v19 = vadd.f32 %v1304_v59, %v3752_v36  ;;  %v1720_v57 = vmul.f32 %v1656_v44, %v4200_v32 }
 0x29e   : > { %v4262_v7 = vadd.f32 %v1393_v40, %v3754_v60  ;;  %1318 = vmatmul.bf16.gmra.mxu0 %v1156_v27  ;;  %1407 = vmatmul.bf16.gmra.mxu1 %v1156_v27 }
 0x29f   : > { %v2583_v4 = vpack.c.bf16 %v2106_v12, %v2105_v20  ;;  %v2863_v47 = vpop.eup %2862  ;;  %v1467_v52 = vmul.f32 0.5, %v4258_v19 }
 0x2a0   : > { %v1941_v34 = vpop.f32.mrf.mxu2  ;;  %v2865_v9 = vpop.eup %2864  ;;  %v1593_v14 = vmul.f32 0.5, %v2863_v47  ;;  %v1468_v13 = vmul.f32 0.5, %v4262_v7 }
 0x2a1   : > { %2584 = vst [vmem:[%s4275_s17] sm:$0xff] %v2583_v4   ;;  %v2030_v38 = vpop.f32.mrf.mxu3  ;;  %v1594_v35 = vmul.f32 0.5, %v2865_v9  ;;  %2866 = vtanh.f32 %v1467_v52  ;;  %v1942_v54 = vadd.f32 %v4208_v39, %v1941_v34  ;;  %v1099_v4 = vmul.f32 %v4024_v55, %v1063_v16 }
 0x2a2   : > { %v1657_v25 = vadd.f32 0.5, %v1593_v14  ;;  %2868 = vtanh.f32 %v1468_v13 }
 0x2a3   : > { %v1658_v15 = vadd.f32 0.5, %v1594_v35  ;;  %v2031_v40 = vadd.f32 %v2030_v38, %v1942_v54  ;;  %v1135_v52 = vadd.f32 %v4053_v24, %v1099_v4 }
 0x2a4   : > { %v1721_v23 = vmul.f32 %v1657_v25, %v4228_v62  ;;  %v1306_v18 = vpop.f32.mrf.mxu0  ;;  %v1100_v62 = vmul.f32 %v4024_v55, %v1064_v30 }
 0x2a5   : > { %v1395_v0 = vpop.f32.mrf.mxu1  ;;  %v1722_v41 = vmul.f32 %v1658_v15, %v4231_v43  ;;  %v1307_v28 = vadd.f32 %v1306_v18, %v3752_v36  ;;  %v2107_v56 = vadd.f32 %v3402_v3, %v2031_v40 }
 0x2a6   : > { %v1396_v45 = vadd.f32 %v1395_v0, %v3754_v60  ;;  %v1773_v20 = vpack.c.bf16 %v1721_v23, %v1719_v42  ;;  %v1136_v32 = vadd.f32 %v4053_v24, %v1100_v62 }
 0x2a7   : > { %v1469_v12 = vmul.f32 0.5, %v1307_v28  ;;  %v2867_v43 = vpop.eup %2866  ;;  %v1774_v49 = vpack.c.bf16 %v1722_v41, %v1720_v57 }
 0x2a8   : > { %v1470_v1 = vmul.f32 0.5, %v1396_v45  ;;  %v1943_v59 = vpop.f32.mrf.mxu2  ;;  %1960 = vmatmul.bf16.gmra.mxu2 %v1773_v20  ;;  %v2869_v47 = vpop.eup %2868  ;;  %v1595_v53 = vmul.f32 0.5, %v2867_v43  ;;  %v1157_v14 = vpack.c.bf16 %v1136_v32, %v1135_v52 }
 0x2a9   : > { %v1944_v31 = vadd.f32 %v4208_v39, %v1943_v59  ;;  %v2032_v50 = vpop.f32.mrf.mxu3  ;;  %2870 = vtanh.f32 %v1469_v12  ;;  %v1596_v11 = vmul.f32 0.5, %v2869_v47 }
 0x2aa   : > { %2872 = vtanh.f32 %v1470_v1  ;;  %2049 = vmatmul.bf16.gmra.mxu3 %v1774_v49  ;;  %v1659_v35 = vadd.f32 0.5, %v1595_v53 }
 0x2ab   : > { %v2033_v21 = vadd.f32 %v2032_v50, %v1944_v31  ;;  %v1660_v3 = vadd.f32 0.5, %v1596_v11 }
 0x2ad   : > { %v2108_v27 = vadd.f32 %v3411_v6, %v2033_v21  ;;  %v1723_v6 = vmul.f32 %v1659_v35, %v4258_v19  ;;  %v1724_v18 = vmul.f32 %v1660_v3, %v4262_v7 }
 0x2ae   : > { %1323 = vmatmul.bf16.gmra.mxu0 %v1157_v14  ;;  %1412 = vmatmul.bf16.gmra.mxu1 %v1157_v14 }
 0x2af   : > { %v2588_v34 = vpack.c.bf16 %v2108_v27, %v2107_v56  ;;  %v2871_v9 = vpop.eup %2870 }
 0x2b0   : > { %v1946_v38 = vpop.f32.mrf.mxu2  ;;  %v2873_v33 = vpop.eup %2872  ;;  %v1597_v25 = vmul.f32 0.5, %v2871_v9 }
 0x2b1   : > { %2675 = vst [vmem:[%s4275_s17 + $0x8] sm:$0xff] %v2588_v34   ;;  %v2035_v13 = vpop.f32.mrf.mxu3  ;;  %v1598_v26 = vmul.f32 0.5, %v2873_v33  ;;  %v1947_v42 = vadd.f32 %v4208_v39, %v1946_v38 }
 0x2b2   : > { %v1661_v44 = vadd.f32 0.5, %v1597_v25 }
 0x2b3   : > { %v1662_v15 = vadd.f32 0.5, %v1598_v26  ;;  %v2036_v41 = vadd.f32 %v2035_v13, %v1947_v42 }
 0x2b4   : > { %v1725_v30 = vmul.f32 %v1661_v44, %v1307_v28 }
 0x2b5   : > { %v1726_v23 = vmul.f32 %v1662_v15, %v1396_v45  ;;  %v2109_v1 = vadd.f32 %v3406_v5, %v2036_v41  ;;  %v681_v45 = vmul.f32 %v4095_v61, %v3424_v17 }
 0x2b6   : > { %v1775_v54 = vpack.c.bf16 %v1725_v30, %v1723_v6 }
 0x2b7   : > { %v1776_v20 = vpack.c.bf16 %v1726_v23, %v1724_v18  ;;  %v713_v62 = vadd.f32 1e-05, %v681_v45 }
 0x2b8   : > { %v1948_v0 = vpop.f32.mrf.mxu2  ;;  %1965 = vmatmul.bf16.gmra.mxu2 %v1775_v54 }
 0x2b9   : > { %v1949_v16 = vadd.f32 %v4208_v39, %v1948_v0  ;;  %v2037_v57 = vpop.f32.mrf.mxu3  ;;  %2874 = vrsqrt.f32 %v713_v62  ;;  %vm949_vm3 = vweird.f32 %v713_v62 }
 0x2ba   : > { %2054 = vmatmul.bf16.gmra.mxu3 %v1776_v20 }
 0x2bb   : > { %v2038_v12 = vadd.f32 %v2037_v57, %v1949_v16 }
 0x2bd   : > { %v2110_v19 = vadd.f32 %v3415_v8, %v2038_v12 }
 0x2bf   : > { %v2593_v28 = vpack.c.bf16 %v2110_v19, %v2109_v1  ;;  %v2875_v7 = vpop.eup %2874 }
 0x2c0   : > { %v944_v59 = vmul.f32 %v2875_v7, %v713_v62  ;;  %vm950_vm4 = vweird.f32 %v2875_v7 }
 0x2c1   : > { %2676 = vst [vmem:[%s4275_s17 + $0x10] sm:$0xff] %v2593_v28   ;;  %vm951_vm5 = vmor %vm949_vm3, %vm950_vm4 }
 0x2c2   : > { %v945_v40 = vmul.f32 %v2875_v7, %v944_v59 }
 0x2c4   : > { %v946_v49 = vmul.f32 0.5, %v945_v40 }
 0x2c6   : > { %v947_v5 = vsub.f32 1.5, %v946_v49 }
 0x2c8   : > { %v948_v61 = vmul.f32 %v2875_v7, %v947_v5 }
 0x2ca   : > { %v952_v52 = vsel %vm951_vm5, %v2875_v7, %v948_v61 }
 0x2cb   : > { %v1065_v38 = vmul.f32 %v952_v52, %v3919_v22 }
 0x2cd   : > { %v1101_v54 = vmul.f32 %v4024_v55, %v1065_v38 }
 0x2cf   : > { %v1137_v20 = vadd.f32 %v4053_v24, %v1101_v54 }
 0x2e2   : > { %v642_v31 = vpop.xlane.xlu0 %641 }
 0x2e3   : > { %v682_v50 = vmul.f32 %v642_v31, %v3424_v17 }
 0x2e5   : > { %v714_v43 = vadd.f32 1e-05, %v682_v50 }
 0x2e7   : > { %2876 = vrsqrt.f32 %v714_v43  ;;  %vm959_vm7 = vweird.f32 %v714_v43 }
 0x2ea   : > { %v644_v4 = vpop.xlane.xlu0 %643 }
 0x2eb   : > { %v683_v8 = vmul.f32 %v644_v4, %v3424_v17 }
 0x2ed   : > { %v2877_v21 = vpop.eup %2876  ;;  %v4313_v32 = vadd.f32 1e-05, %v683_v8 }
 0x2ee   : > { %v954_v47 = vmul.f32 %v2877_v21, %v714_v43  ;;  %vm960_vm6 = vweird.f32 %v2877_v21 }
 0x2ef   : > { %2878 = vrsqrt.f32 %v4313_v32  ;;  %vm961_vm8 = vmor %vm959_vm7, %vm960_vm6  ;;  %vm969_vm10 = vweird.f32 %v4313_v32 }
 0x2f0   : > { %v955_v53 = vmul.f32 %v2877_v21, %v954_v47 }
 0x2f2   : > { %v956_v56 = vmul.f32 0.5, %v955_v53  ;;  %v491_v27 = vpop.xlane.xlu0 %490 }
 0x2f3   : > { %v530_v34 = vmul.f32 %v3424_v17, %v491_v27  ;;  %v650_v25 = vpop.xlane.xlu2 %649  ;;  %v646_v13 = vpop.xlane.xlu1 %645 }
 0x2f4   : > { %v957_v9 = vsub.f32 1.5, %v956_v56  ;;  %v686_v26 = vmul.f32 %v650_v25, %v3424_v17  ;;  %v684_v44 = vmul.f32 %v646_v13, %v3424_v17  ;;  %v1309_v22 = vpop.f32.mrf.mxu0 }
 0x2f5   : > { %v4317_v11 = vpop.eup %2878  ;;  %v4320_v14 = vsub.f32 %v4062_v2, %v530_v34  ;;  %v1398_v42 = vpop.f32.mrf.mxu1  ;;  %v4337_v0 = vadd.f32 %v1309_v22, %v3752_v36 }
 0x2f6   : > { %v958_v33 = vmul.f32 %v2877_v21, %v957_v9  ;;  %v964_v35 = vmul.f32 %v4317_v11, %v4313_v32  ;;  %v4329_v6 = vadd.f32 1e-05, %v686_v26  ;;  %v4331_v30 = vadd.f32 1e-05, %v684_v44 }
 0x2f7   : > { %v594_v3 = vmul.f32 %v4320_v14, %v4320_v14  ;;  %v4340_v41 = vadd.f32 %v1398_v42, %v3754_v60  ;;  %v1471_v12 = vmul.f32 0.5, %v4337_v0  ;;  %vm970_vm9 = vweird.f32 %v4317_v11 }
 0x2f8   : > { %v962_v15 = vsel %vm961_vm8, %v2877_v21, %v958_v33  ;;  %v965_v18 = vmul.f32 %v4317_v11, %v964_v35  ;;  %2880 = vrsqrt.f32 %v4331_v30  ;;  %vm4374_vm11 = vmor %vm969_vm10, %vm970_vm9  ;;  %vm979_vm12 = vweird.f32 %v4331_v30 }
 0x2f9   : > { %657 = vadd.xlane.f32.xlu0 %v594_v3  ;;  %v1066_v23 = vmul.f32 %v962_v15, %v3994_v63  ;;  %2882 = vrsqrt.f32 %v4329_v6  ;;  %v1472_v1 = vmul.f32 0.5, %v4340_v41  ;;  %vm999_vm15 = vweird.f32 %v4329_v6 }
 0x2fa   : > { %v966_v57 = vmul.f32 0.5, %v965_v18  ;;  %2884 = vtanh.f32 %v1471_v12 }
 0x2fb   : > { %v1102_v16 = vmul.f32 %v4024_v55, %v1066_v23  ;;  %v648_v19 = vpop.xlane.xlu1 %647  ;;  %2886 = vtanh.f32 %v1472_v1 }
 0x2fc   : > { %v685_v45 = vmul.f32 %v648_v19, %v3424_v17  ;;  %v652_v62 = vpop.xlane.xlu0 %651  ;;  %v1311_v7 = vpop.f32.mrf.mxu0  ;;  %v967_v31 = vsub.f32 1.5, %v966_v57 }
 0x2fd   : > { %v1138_v63 = vadd.f32 %v4053_v24, %v1102_v16  ;;  %v1400_v59 = vpop.f32.mrf.mxu1  ;;  %v687_v5 = vmul.f32 %v652_v62, %v3424_v17  ;;  %v1312_v4 = vadd.f32 %v1311_v7, %v3752_v36 }
 0x2fe   : > { %v4350_v40 = vpop.eup %2880  ;;  %v4352_v50 = vadd.f32 1e-05, %v685_v45  ;;  %v4362_v8 = vadd.f32 %v1400_v59, %v3754_v60  ;;  %v968_v47 = vmul.f32 %v4317_v11, %v967_v31 }
 0x2ff   : > { %v1158_v28 = vpack.c.bf16 %v1138_v63, %v1137_v20  ;;  %v4354_v43 = vpop.eup %2882  ;;  %v974_v49 = vmul.f32 %v4350_v40, %v4331_v30  ;;  %v1473_v61 = vmul.f32 0.5, %v1312_v4  ;;  %v4370_v52 = vadd.f32 1e-05, %v687_v5 }
 0x300   : > { %2888 = vrsqrt.f32 %v4352_v50  ;;  %v994_v53 = vmul.f32 %v4354_v43, %v4329_v6  ;;  %v1474_v56 = vmul.f32 0.5, %v4362_v8  ;;  %v2885_v9 = vpop.eup %2884  ;;  %vm980_vm13 = vweird.f32 %v4350_v40 }
 0x301   : > { %1328 = vmatmul.bf16.gmra.mxu0 %v1158_v28  ;;  %1417 = vmatmul.bf16.gmra.mxu1 %v1158_v28  ;;  %v975_v21 = vmul.f32 %v4350_v40, %v974_v49  ;;  %2890 = vtanh.f32 %v1473_v61  ;;  %v2887_v33 = vpop.eup %2886  ;;  %v972_v26 = vsel %vm4374_vm11, %v4317_v11, %v968_v47  ;;  %v1599_v15 = vmul.f32 0.5, %v2885_v9  ;;  %vm4392_vm14 = vmor %vm979_vm12, %vm980_vm13 }
 0x302   : > { %2892 = vtanh.f32 %v1474_v56  ;;  %v995_v32 = vmul.f32 %v4354_v43, %v994_v53  ;;  %v1600_v42 = vmul.f32 0.5, %v2887_v33  ;;  %v1067_v23 = vmul.f32 %v972_v26, %v4022_v51 }
 0x303   : > { %v976_v27 = vmul.f32 0.5, %v975_v21  ;;  %v654_v34 = vpop.xlane.xlu1 %653  ;;  %2894 = vrsqrt.f32 %v4370_v52  ;;  %v1663_v12 = vadd.f32 0.5, %v1599_v15  ;;  %vm989_vm0 = vweird.f32 %v4352_v50 }
 0x304   : > { %v688_v38 = vmul.f32 %v654_v34, %v3424_v17  ;;  %v996_v16 = vmul.f32 0.5, %v995_v32  ;;  %v1664_v62 = vadd.f32 0.5, %v1600_v42  ;;  %v1103_v21 = vmul.f32 %v4024_v55, %v1067_v23 }
 0x305   : > { %v977_v25 = vsub.f32 1.5, %v976_v27  ;;  %v1727_v9 = vmul.f32 %v1663_v12, %v4337_v0  ;;  %vm1000_vm2 = vweird.f32 %v4354_v43  ;;  %vm1009_vm7 = vweird.f32 %v4370_v52 }
 0x306   : > { %v4380_v13 = vpop.eup %2888  ;;  %v4386_v44 = vadd.f32 1e-05, %v688_v38  ;;  %v997_v34 = vsub.f32 1.5, %v996_v16  ;;  %v1728_v33 = vmul.f32 %v1664_v62, %v4340_v41  ;;  %v1139_v30 = vadd.f32 %v4053_v24, %v1103_v21  ;;  %vm4443_vm4 = vmor %vm999_vm15, %vm1000_vm2  ;;  %v4826_v21 = vld [vmem:[#allocation40_spill] sm:$0xff] }
 0x307   : > { %v978_v3 = vmul.f32 %v4350_v40, %v977_v25  ;;  %v984_v22 = vmul.f32 %v4380_v13, %v4352_v50  ;;  %v2891_v11 = vpop.eup %2890  ;;  %vm990_vm1 = vweird.f32 %v4380_v13 }
 0x308   : > { %2896 = vrsqrt.f32 %v4386_v44  ;;  %v2893_v18 = vpop.eup %2892  ;;  %v1601_v20 = vmul.f32 0.5, %v2891_v11  ;;  %vm4431_vm3 = vmor %vm989_vm0, %vm990_vm1  ;;  %vm1019_vm5 = vweird.f32 %v4386_v44 }
 0x309   : > { %v985_v54 = vmul.f32 %v4380_v13, %v984_v22  ;;  %v982_v57 = vsel %vm4392_vm14, %v4350_v40, %v978_v3  ;;  %v1602_v19 = vmul.f32 0.5, %v2893_v18  ;;  %v4409_v31 = vpop.eup %2894  ;;  %v998_v3 = vmul.f32 %v4354_v43, %v997_v34 }
 0x30a   : > { %v1951_v63 = vpop.f32.mrf.mxu2  ;;  %v1665_v7 = vadd.f32 0.5, %v1601_v20  ;;  %v1068_v47 = vmul.f32 %v982_v57, %v4086_v37  ;;  %v1004_v35 = vmul.f32 %v4409_v31, %v4370_v52  ;;  %vm1010_vm8 = vweird.f32 %v4409_v31 }
 0x30b   : > { %v986_v1 = vmul.f32 0.5, %v985_v54  ;;  %v1314_v28 = vpop.f32.mrf.mxu0  ;;  %v1403_v45 = vpop.f32.mrf.mxu1  ;;  %v1666_v5 = vadd.f32 0.5, %v1602_v19  ;;  %v1952_v37 = vadd.f32 %v4208_v39, %v1951_v63  ;;  %vm4509_vm10 = vmor %vm1009_vm7, %vm1010_vm8 }
 0x30c   : > { %v4404_v51 = vadd.f32 %v1314_v28, %v3752_v36  ;;  %v4407_v59 = vadd.f32 %v1403_v45, %v3754_v60  ;;  %v2040_v40 = vpop.f32.mrf.mxu3  ;;  %v1729_v53 = vmul.f32 %v1665_v7, %v1312_v4  ;;  %v1104_v26 = vmul.f32 %v4024_v55, %v1068_v47 }
 0x30d   : > { %v987_v49 = vsub.f32 1.5, %v986_v1  ;;  %v1730_v38 = vmul.f32 %v1666_v5, %v4362_v8  ;;  %v2041_v11 = vadd.f32 %v2040_v40, %v1952_v37  ;;  %v1005_v6 = vmul.f32 %v4409_v31, %v1004_v35 }
 0x30e   : > { %v4413_v61 = vpop.eup %2896  ;;  %v1475_v56 = vmul.f32 0.5, %v4404_v51  ;;  %v1476_v27 = vmul.f32 0.5, %v4407_v59  ;;  %v1777_v0 = vpack.c.bf16 %v1729_v53, %v1727_v9  ;;  %v1140_v18 = vadd.f32 %v4053_v24, %v1104_v26 }
 0x30f   : > { %v988_v4 = vmul.f32 %v4380_v13, %v987_v49  ;;  %v1014_v25 = vmul.f32 %v4413_v61, %v4386_v44  ;;  %v1778_v41 = vpack.c.bf16 %v1730_v38, %v1728_v33  ;;  %v1002_v45 = vsel %vm4443_vm4, %v4354_v43, %v998_v3 }
 0x310   : > { %2898 = vtanh.f32 %v1475_v56  ;;  %1970 = vmatmul.bf16.gmra.mxu2 %v1777_v0  ;;  %v1159_v1 = vpack.c.bf16 %v1140_v18, %v1139_v30  ;;  %v2111_v7 = vadd.f32 %v3421_v10, %v2041_v11  ;;  %v1070_v47 = vmul.f32 %v1002_v45, %v4826_v21 }
 0x311   : > { %2900 = vtanh.f32 %v1476_v27  ;;  %2059 = vmatmul.bf16.gmra.mxu3 %v1778_v41  ;;  %v992_v16 = vsel %vm4431_vm3, %v4380_v13, %v988_v4  ;;  %v1015_v20 = vmul.f32 %v4413_v61, %v1014_v25  ;;  %v4825_v13 = vld [vmem:[#allocation17_spill] sm:$0xff]  ;;  %v1006_v53 = vmul.f32 0.5, %v1005_v6  ;;  %v4479_v41 = vld [vmem:[#allocation5] ss:$0 sm:$0xff] }
 0x312   : > { %v1953_v32 = vpop.f32.mrf.mxu2  ;;  %1333 = vmatmul.bf16.gmra.mxu0 %v1159_v1  ;;  %1422 = vmatmul.bf16.gmra.mxu1 %v1159_v1  ;;  %v1069_v5 = vmul.f32 %v992_v16, %v4137_v46  ;;  %v1106_v26 = vmul.f32 %v4479_v41, %v1070_v47  ;;  %vm1020_vm6 = vweird.f32 %v4413_v61 }
 0x313   : > { %v1316_v15 = vpop.f32.mrf.mxu0  ;;  %v1405_v22 = vpop.f32.mrf.mxu1  ;;  %v1954_v42 = vadd.f32 %v4208_v39, %v1953_v32  ;;  %v1016_v40 = vmul.f32 0.5, %v1015_v20  ;;  %v1007_v25 = vsub.f32 1.5, %v1006_v53  ;;  %vm4491_vm9 = vmor %vm1019_vm5, %vm1020_vm6  ;;  %v4498_v20 = vld [vmem:[%s4705_s2] ss:$0 sm:$0xff] }
 0x314   : > { %v4448_v23 = vadd.f32 %v1316_v15, %v3752_v36  ;;  %v4451_v54 = vadd.f32 %v1405_v22, %v3754_v60  ;;  %v2042_v63 = vpop.f32.mrf.mxu3  ;;  %v1105_v37 = vmul.f32 %v4024_v55, %v1069_v5 }
 0x315   : > { %v2043_v19 = vadd.f32 %v2042_v63, %v1954_v42  ;;  %v1017_v35 = vsub.f32 1.5, %v1016_v40  ;;  %v1008_v18 = vmul.f32 %v4409_v31, %v1007_v25  ;;  %v1142_v63 = vadd.f32 %v4498_v20, %v1106_v26 }
 0x316   : > { %v1477_v57 = vmul.f32 0.5, %v4448_v23  ;;  %v1478_v12 = vmul.f32 0.5, %v4451_v54  ;;  %v2899_v28 = vpop.eup %2898  ;;  %v1141_v11 = vadd.f32 %v4053_v24, %v1105_v37 }
 0x317   : > { %v2901_v62 = vpop.eup %2900  ;;  %v2112_v49 = vadd.f32 %v4825_v13, %v2043_v19  ;;  %v1603_v34 = vmul.f32 0.5, %v2899_v28  ;;  %v1018_v42 = vmul.f32 %v4413_v61, %v1017_v35 }
 0x318   : > { %2902 = vtanh.f32 %v1477_v57  ;;  %v1604_v43 = vmul.f32 0.5, %v2901_v62 }
 0x319   : > { %2904 = vtanh.f32 %v1478_v12  ;;  %v2598_v56 = vpack.c.bf16 %v2112_v49, %v2111_v7  ;;  %v1667_v3 = vadd.f32 0.5, %v1603_v34  ;;  %v1160_v49 = vpack.c.bf16 %v1142_v63, %v1141_v11 }
 0x31a   : > { %v1668_v15 = vadd.f32 0.5, %v1604_v43 }
 0x31b   : > { %v1956_v27 = vpop.f32.mrf.mxu2  ;;  %v1319_v9 = vpop.f32.mrf.mxu0  ;;  %2677 = vst [vmem:[%s4275_s17 + $0x18] sm:$0xff] %v2598_v56   ;;  %v1731_v24 = vmul.f32 %v1667_v3, %v4404_v51 }
 0x31c   : > { %v1408_v38 = vpop.f32.mrf.mxu1  ;;  %v4470_v10 = vadd.f32 %v1319_v9, %v3752_v36  ;;  %v1957_v30 = vadd.f32 %v4208_v39, %v1956_v27  ;;  %v1732_v12 = vmul.f32 %v1668_v15, %v4407_v59  ;;  %v4831_v27 = vld [vmem:[#allocation18_spill] sm:$0xff] }
 0x31d   : > { %v4473_v33 = vadd.f32 %v1408_v38, %v3754_v60  ;;  %v2045_v46 = vpop.f32.mrf.mxu3  ;;  %v4833_v38 = vld [vmem:[#allocation41_spill] sm:$0xff] }
 0x31e   : > { %v2903_v4 = vpop.eup %2902  ;;  %v1479_v0 = vmul.f32 0.5, %v4470_v10  ;;  %v2046_v7 = vadd.f32 %v2045_v46, %v1957_v30 }
 0x31f   : > { %v1480_v8 = vmul.f32 0.5, %v4473_v33  ;;  %v2905_v32 = vpop.eup %2904  ;;  %v1605_v22 = vmul.f32 0.5, %v2903_v4 }
 0x320   : > { %v1606_v55 = vmul.f32 0.5, %v2905_v32  ;;  %2906 = vtanh.f32 %v1479_v0  ;;  %v2113_v34 = vadd.f32 %v4831_v27, %v2046_v7 }
 0x321   : > { %v1669_v50 = vadd.f32 0.5, %v1605_v22  ;;  %2908 = vtanh.f32 %v1480_v8 }
 0x322   : > { %v1670_v6 = vadd.f32 0.5, %v1606_v55  ;;  %1338 = vmatmul.bf16.gmra.mxu0 %v1160_v49  ;;  %1427 = vmatmul.bf16.gmra.mxu1 %v1160_v49 }
 0x323   : > { %v1958_v57 = vpop.f32.mrf.mxu2  ;;  %v1733_v44 = vmul.f32 %v1669_v50, %v4448_v23  ;;  %v1321_v1 = vpop.f32.mrf.mxu0  ;;  %v1022_v23 = vsel %vm4491_vm9, %v4413_v61, %v1018_v42  ;;  %v4832_v61 = vld [vmem:[#allocation20_spill] sm:$0xff] }
 0x324   : > { %v1410_v19 = vpop.f32.mrf.mxu1  ;;  %v1959_v28 = vadd.f32 %v4208_v39, %v1958_v57  ;;  %v1734_v62 = vmul.f32 %v1670_v6, %v4451_v54  ;;  %v1322_v51 = vadd.f32 %v1321_v1, %v3752_v36  ;;  %v1012_v54 = vsel %vm4509_vm10, %v4409_v31, %v1008_v18 }
 0x325   : > { %v1411_v59 = vadd.f32 %v1410_v19, %v3754_v60  ;;  %v1779_v13 = vpack.c.bf16 %v1733_v44, %v1731_v24  ;;  %v2047_v5 = vpop.f32.mrf.mxu3  ;;  %v1072_v9 = vmul.f32 %v1022_v23, %v4185_v58  ;;  %v1071_v35 = vmul.f32 %v1012_v54, %v4833_v38 }
 0x326   : > { %v1481_v40 = vmul.f32 0.5, %v1322_v51  ;;  %v1780_v21 = vpack.c.bf16 %v1734_v62, %v1732_v12  ;;  %v2048_v47 = vadd.f32 %v2047_v5, %v1959_v28  ;;  %v2907_v53 = vpop.eup %2906 }
 0x327   : > { %v1482_v52 = vmul.f32 0.5, %v1411_v59  ;;  %1975 = vmatmul.bf16.gmra.mxu2 %v1779_v13  ;;  %v2909_v56 = vpop.eup %2908  ;;  %v1607_v46 = vmul.f32 0.5, %v2907_v53  ;;  %v1108_v58 = vmul.f32 %v4479_v41, %v1072_v9  ;;  %v1107_v55 = vmul.f32 %v4479_v41, %v1071_v35  ;;  %v4834_v53 = vld [vmem:[#allocation22_spill] sm:$0xff] }
 0x328   : > { %2910 = vtanh.f32 %v1481_v40  ;;  %2064 = vmatmul.bf16.gmra.mxu3 %v1780_v21  ;;  %v2114_v43 = vadd.f32 %v4832_v61, %v2048_v47  ;;  %v1608_v31 = vmul.f32 0.5, %v2909_v56 }
 0x329   : > { %2912 = vtanh.f32 %v1482_v52  ;;  %v1671_v15 = vadd.f32 0.5, %v1607_v46  ;;  %v1144_v63 = vadd.f32 %v4498_v20, %v1108_v58  ;;  %v1143_v12 = vadd.f32 %v4498_v20, %v1107_v55 }
 0x32a   : > { %v2603_v37 = vpack.c.bf16 %v2114_v43, %v2113_v34  ;;  %v1672_v42 = vadd.f32 0.5, %v1608_v31 }
 0x32b   : > { %v1961_v4 = vpop.f32.mrf.mxu2  ;;  %v1324_v25 = vpop.f32.mrf.mxu0  ;;  %v1735_v57 = vmul.f32 %v1671_v15, %v4470_v10  ;;  %v1161_v5 = vpack.c.bf16 %v1144_v63, %v1143_v12  ;;  %v4836_v63 = vld [vmem:[#allocation21_spill] sm:$0xff] }
 0x32c   : > { %v1413_v0 = vpop.f32.mrf.mxu1  ;;  %2678 = vst [vmem:[%s4275_s17 + $0x20] sm:$0xff] %v2603_v37   ;;  %v4528_v8 = vadd.f32 %v1324_v25, %v3752_v36  ;;  %v1962_v16 = vadd.f32 %v4208_v39, %v1961_v4  ;;  %v1736_v1 = vmul.f32 %v1672_v42, %v4473_v33 }
 0x32d   : > { %v4531_v26 = vadd.f32 %v1413_v0, %v3754_v60  ;;  %v2050_v32 = vpop.f32.mrf.mxu3 }
 0x32e   : > { %v2911_v3 = vpop.eup %2910  ;;  %v1483_v22 = vmul.f32 0.5, %v4528_v8  ;;  %v2051_v23 = vadd.f32 %v2050_v32, %v1962_v16 }
 0x32f   : > { %v2913_v30 = vpop.eup %2912  ;;  %v1609_v50 = vmul.f32 0.5, %v2911_v3  ;;  %v1484_v11 = vmul.f32 0.5, %v4531_v26 }
 0x330   : > { %v1610_v18 = vmul.f32 0.5, %v2913_v30  ;;  %2914 = vtanh.f32 %v1483_v22  ;;  %v2115_v54 = vadd.f32 %v4834_v53, %v2051_v23 }
 0x331   : > { %v1673_v6 = vadd.f32 0.5, %v1609_v50  ;;  %2916 = vtanh.f32 %v1484_v11 }
 0x332   : > { %v1674_v24 = vadd.f32 0.5, %v1610_v18  ;;  %1343 = vmatmul.bf16.gmra.mxu0 %v1161_v5  ;;  %1432 = vmatmul.bf16.gmra.mxu1 %v1161_v5 }
 0x333   : > { %v1963_v44 = vpop.f32.mrf.mxu2  ;;  %v1737_v19 = vmul.f32 %v1673_v6, %v1322_v51  ;;  %v1326_v28 = vpop.f32.mrf.mxu0 }
 0x334   : > { %v1415_v45 = vpop.f32.mrf.mxu1  ;;  %v1964_v62 = vadd.f32 %v4208_v39, %v1963_v44  ;;  %v1738_v7 = vmul.f32 %v1674_v24, %v1411_v59  ;;  %v1327_v13 = vadd.f32 %v1326_v28, %v3752_v36  ;;  %v4835_v59 = vld [vmem:[#allocation19_spill] sm:$0xff] }
 0x335   : > { %v1416_v49 = vadd.f32 %v1415_v45, %v3754_v60  ;;  %v1781_v10 = vpack.c.bf16 %v1737_v19, %v1735_v57  ;;  %v2052_v40 = vpop.f32.mrf.mxu3  ;;  %v4837_v24 = vld [vmem:[#allocation23_spill] sm:$0xff] }
 0x336   : > { %v1485_v52 = vmul.f32 0.5, %v1327_v13  ;;  %v1782_v47 = vpack.c.bf16 %v1738_v7, %v1736_v1  ;;  %v2053_v33 = vadd.f32 %v2052_v40, %v1964_v62  ;;  %v2915_v51 = vpop.eup %2914 }
 0x337   : > { %v1486_v21 = vmul.f32 0.5, %v1416_v49  ;;  %1980 = vmatmul.bf16.gmra.mxu2 %v1781_v10  ;;  %v2917_v27 = vpop.eup %2916  ;;  %v1611_v43 = vmul.f32 0.5, %v2915_v51 }
 0x338   : > { %2918 = vtanh.f32 %v1485_v52  ;;  %2069 = vmatmul.bf16.gmra.mxu3 %v1782_v47  ;;  %v2116_v56 = vadd.f32 %v4835_v59, %v2053_v33  ;;  %v1612_v9 = vmul.f32 0.5, %v2917_v27 }
 0x339   : > { %2920 = vtanh.f32 %v1486_v21  ;;  %v1675_v37 = vadd.f32 0.5, %v1611_v43 }
 0x33a   : > { %v2608_v34 = vpack.c.bf16 %v2116_v56, %v2115_v54  ;;  %v1676_v31 = vadd.f32 0.5, %v1612_v9 }
 0x33b   : > { %v1966_v61 = vpop.f32.mrf.mxu2  ;;  %v1739_v15 = vmul.f32 %v1675_v37, %v4528_v8  ;;  %v656_v8 = vpop.xlane.xlu2 %655 }
 0x33c   : > { %2679 = vst [vmem:[%s4275_s17 + $0x28] sm:$0xff] %v2608_v34   ;;  %v1967_v0 = vadd.f32 %v4208_v39, %v1966_v61  ;;  %v1740_v30 = vmul.f32 %v1676_v31, %v4531_v26  ;;  %v689_v1 = vmul.f32 %v656_v8, %v3424_v17 }
 0x33d   : > { %v2055_v38 = vpop.f32.mrf.mxu3 }
 0x33e   : > { %v2919_v35 = vpop.eup %2918  ;;  %v2056_v50 = vadd.f32 %v2055_v38, %v1967_v0 }
 0x33f   : > { %v2921_v46 = vpop.eup %2920  ;;  %v1613_v4 = vmul.f32 0.5, %v2919_v35 }
 0x340   : > { %v1614_v25 = vmul.f32 0.5, %v2921_v46  ;;  %v2117_v57 = vadd.f32 %v4836_v63, %v2056_v50 }
 0x341   : > { %v1677_v32 = vadd.f32 0.5, %v1613_v4 }
 0x342   : > { %v1678_v58 = vadd.f32 0.5, %v1614_v25 }
 0x343   : > { %v1968_v3 = vpop.f32.mrf.mxu2  ;;  %v1741_v22 = vmul.f32 %v1677_v32, %v1327_v13 }
 0x344   : > { %v1969_v55 = vadd.f32 %v4208_v39, %v1968_v3  ;;  %v1742_v42 = vmul.f32 %v1678_v58, %v1416_v49  ;;  %v721_v39 = vadd.f32 1e-05, %v689_v1 }
 0x345   : > { %v1783_v11 = vpack.c.bf16 %v1741_v22, %v1739_v15  ;;  %v2057_v18 = vpop.f32.mrf.mxu3 }
 0x346   : > { %v1784_v16 = vpack.c.bf16 %v1742_v42, %v1740_v30  ;;  %v2058_v6 = vadd.f32 %v2057_v18, %v1969_v55  ;;  %2922 = vrsqrt.f32 %v721_v39  ;;  %vm1029_vm11 = vweird.f32 %v721_v39 }
 0x347   : > { %1985 = vmatmul.bf16.gmra.mxu2 %v1783_v11 }
 0x348   : > { %2074 = vmatmul.bf16.gmra.mxu3 %v1784_v16  ;;  %v2118_v12 = vadd.f32 %v4837_v24, %v2058_v6 }
 0x34a   : > { %v2613_v44 = vpack.c.bf16 %v2118_v12, %v2117_v57 }
 0x34c   : > { %2680 = vst [vmem:[%s4275_s17 + $0x30] sm:$0xff] %v2613_v44   ;;  %v2923_v26 = vpop.eup %2922 }
 0x34d   : > { %v1024_v19 = vmul.f32 %v2923_v26, %v721_v39  ;;  %vm1030_vm12 = vweird.f32 %v2923_v26 }
 0x34e   : > { %vm1031_vm13 = vmor %vm1029_vm11, %vm1030_vm12 }
 0x34f   : > { %v1025_v28 = vmul.f32 %v2923_v26, %v1024_v19 }
 0x351   : > { %v1026_v23 = vmul.f32 0.5, %v1025_v28  ;;  %v4572_v28 = vld [vmem:[%s4709_s6] ss:$0 sm:$0xff] }
 0x353   : > { %v1027_v13 = vsub.f32 1.5, %v1026_v23 }
 0x355   : > { %v1028_v10 = vmul.f32 %v2923_v26, %v1027_v13 }
 0x357   : > { %v1032_v52 = vsel %vm1031_vm13, %v2923_v26, %v1028_v10 }
 0x358   : > { %v1073_v53 = vmul.f32 %v1032_v52, %v4220_v48 }
 0x35a   : > { %v1109_v43 = vmul.f32 %v4479_v41, %v1073_v53  ;;  %v4838_v53 = vld [vmem:[#allocation24_spill] sm:$0xff] }
 0x35c   : > { %v1145_v37 = vadd.f32 %v4498_v20, %v1109_v43 }
 0x36c   : > { %v658_v45 = vpop.xlane.xlu0 %657 }
 0x36d   : > { %v690_v62 = vmul.f32 %v658_v45, %v3424_v17 }
 0x36f   : > { %v722_v7 = vadd.f32 1e-05, %v690_v62 }
 0x371   : > { %2924 = vrsqrt.f32 %v722_v7  ;;  %vm1039_vm15 = vweird.f32 %v722_v7 }
 0x377   : > { %v2925_v49 = vpop.eup %2924 }
 0x378   : > { %v1034_v5 = vmul.f32 %v2925_v49, %v722_v7  ;;  %vm1040_vm14 = vweird.f32 %v2925_v49 }
 0x379   : > { %vm1041_vm0 = vmor %vm1039_vm15, %vm1040_vm14 }
 0x37a   : > { %v1035_v40 = vmul.f32 %v2925_v49, %v1034_v5 }
 0x37c   : > { %v1036_v21 = vmul.f32 0.5, %v1035_v40 }
 0x37e   : > { %v1037_v47 = vsub.f32 1.5, %v1036_v21  ;;  %v1329_v33 = vpop.f32.mrf.mxu0  ;;  %v1418_v51 = vpop.f32.mrf.mxu1 }
 0x37f   : > { %v1330_v17 = vadd.f32 %v1329_v33, %v3752_v36  ;;  %v1419_v54 = vadd.f32 %v1418_v51, %v3754_v60 }
 0x380   : > { %v1038_v59 = vmul.f32 %v2925_v49, %v1037_v47 }
 0x381   : > { %v1487_v56 = vmul.f32 0.5, %v1330_v17  ;;  %v1488_v34 = vmul.f32 0.5, %v1419_v54 }
 0x382   : > { %v1042_v27 = vsel %vm1041_vm0, %v2925_v49, %v1038_v59 }
 0x383   : > { %v1074_v61 = vmul.f32 %v1042_v27, %v4320_v14  ;;  %2926 = vtanh.f32 %v1487_v56 }
 0x384   : > { %2928 = vtanh.f32 %v1488_v34 }
 0x385   : > { %v1110_v9 = vmul.f32 %v4479_v41, %v1074_v61 }
 0x386   : > { %v1331_v38 = vpop.f32.mrf.mxu0  ;;  %v1420_v48 = vpop.f32.mrf.mxu1 }
 0x387   : > { %v1332_v35 = vadd.f32 %v1331_v38, %v3752_v36  ;;  %v1421_v46 = vadd.f32 %v1420_v48, %v3754_v60  ;;  %v1146_v4 = vadd.f32 %v4498_v20, %v1110_v9 }
 0x389   : > { %v1489_v31 = vmul.f32 0.5, %v1332_v35  ;;  %v1490_v25 = vmul.f32 0.5, %v1421_v46  ;;  %v1162_v0 = vpack.c.bf16 %v1146_v4, %v1145_v37  ;;  %v2927_v14 = vpop.eup %2926 }
 0x38a   : > { %v2929_v32 = vpop.eup %2928  ;;  %v1615_v41 = vmul.f32 0.5, %v2927_v14 }
 0x38b   : > { %2930 = vtanh.f32 %v1489_v31  ;;  %1348 = vmatmul.bf16.gmra.mxu0 %v1162_v0  ;;  %1437 = vmatmul.bf16.gmra.mxu1 %v1162_v0  ;;  %v1616_v58 = vmul.f32 0.5, %v2929_v32 }
 0x38c   : > { %2932 = vtanh.f32 %v1490_v25  ;;  %v1679_v22 = vadd.f32 0.5, %v1615_v41 }
 0x38d   : > { %v1680_v30 = vadd.f32 0.5, %v1616_v58 }
 0x38e   : > { %v1743_v20 = vmul.f32 %v1679_v22, %v1330_v17 }
 0x38f   : > { %v1744_v16 = vmul.f32 %v1680_v30, %v1419_v54  ;;  %v1334_v57 = vpop.f32.mrf.mxu0  ;;  %v1423_v24 = vpop.f32.mrf.mxu1  ;;  %v4839_v54 = vld [vmem:[#allocation25_spill] sm:$0xff] }
 0x390   : > { %v1335_v44 = vadd.f32 %v1334_v57, %v3752_v36  ;;  %v1424_v8 = vadd.f32 %v1423_v24, %v3754_v60 }
 0x391   : > { %v2931_v3 = vpop.eup %2930 }
 0x392   : > { %v2933_v15 = vpop.eup %2932  ;;  %v1617_v55 = vmul.f32 0.5, %v2931_v3  ;;  %v1491_v26 = vmul.f32 0.5, %v1335_v44  ;;  %v1492_v19 = vmul.f32 0.5, %v1424_v8 }
 0x393   : > { %v1618_v42 = vmul.f32 0.5, %v2933_v15  ;;  %v1971_v1 = vpop.f32.mrf.mxu2 }
 0x394   : > { %v1681_v50 = vadd.f32 0.5, %v1617_v55  ;;  %v2060_v39 = vpop.f32.mrf.mxu3  ;;  %v1972_v45 = vadd.f32 %v4572_v28, %v1971_v1  ;;  %2934 = vtanh.f32 %v1491_v26 }
 0x395   : > { %v1682_v11 = vadd.f32 0.5, %v1618_v42  ;;  %2936 = vtanh.f32 %v1492_v19 }
 0x396   : > { %v1745_v18 = vmul.f32 %v1681_v50, %v1332_v35  ;;  %v2061_v10 = vadd.f32 %v2060_v39, %v1972_v45 }
 0x397   : > { %v1746_v6 = vmul.f32 %v1682_v11, %v1421_v46  ;;  %v1336_v62 = vpop.f32.mrf.mxu0  ;;  %v1425_v7 = vpop.f32.mrf.mxu1 }
 0x398   : > { %v1785_v63 = vpack.c.bf16 %v1745_v18, %v1743_v20  ;;  %v1337_v23 = vadd.f32 %v1336_v62, %v3752_v36  ;;  %v1426_v13 = vadd.f32 %v1425_v7, %v3754_v60  ;;  %v2119_v17 = vadd.f32 %v4838_v53, %v2061_v10 }
 0x399   : > { %v1786_v12 = vpack.c.bf16 %v1746_v6, %v1744_v16 }
 0x39a   : > { %1990 = vmatmul.bf16.gmra.mxu2 %v1785_v63  ;;  %v1493_v40 = vmul.f32 0.5, %v1337_v23  ;;  %v1494_v52 = vmul.f32 0.5, %v1426_v13  ;;  %v2935_v33 = vpop.eup %2934 }
 0x39b   : > { %2079 = vmatmul.bf16.gmra.mxu3 %v1786_v12  ;;  %v1973_v49 = vpop.f32.mrf.mxu2  ;;  %v2937_v51 = vpop.eup %2936  ;;  %v1619_v56 = vmul.f32 0.5, %v2935_v33 }
 0x39c   : > { %v1974_v5 = vadd.f32 %v4572_v28, %v1973_v49  ;;  %v2062_v21 = vpop.f32.mrf.mxu3  ;;  %2938 = vtanh.f32 %v1493_v40  ;;  %v1620_v61 = vmul.f32 0.5, %v2937_v51  ;;  %v4841_v49 = vld [vmem:[#allocation28_spill] sm:$0xff] }
 0x39d   : > { %2940 = vtanh.f32 %v1494_v52  ;;  %v1683_v37 = vadd.f32 0.5, %v1619_v56 }
 0x39e   : > { %v2063_v47 = vadd.f32 %v2062_v21, %v1974_v5  ;;  %v1684_v25 = vadd.f32 0.5, %v1620_v61 }
 0x39f   : > { %v1339_v34 = vpop.f32.mrf.mxu0  ;;  %v1428_v9 = vpop.f32.mrf.mxu1  ;;  %v1747_v3 = vmul.f32 %v1683_v37, %v1335_v44 }
 0x3a0   : > { %v2120_v59 = vadd.f32 %v4839_v54, %v2063_v47  ;;  %v4581_v43 = vadd.f32 %v1339_v34, %v3752_v36  ;;  %v4585_v38 = vadd.f32 %v1428_v9, %v3754_v60  ;;  %v1748_v55 = vmul.f32 %v1684_v25, %v1424_v8 }
 0x3a2   : > { %v2618_v27 = vpack.c.bf16 %v2120_v59, %v2119_v17  ;;  %v2939_v48 = vpop.eup %2938  ;;  %v1495_v35 = vmul.f32 0.5, %v4581_v43  ;;  %v1496_v31 = vmul.f32 0.5, %v4585_v38 }
 0x3a3   : > { %v2941_v46 = vpop.eup %2940  ;;  %v1621_v4 = vmul.f32 0.5, %v2939_v48 }
 0x3a4   : > { %2681 = vst [vmem:[%s4275_s17 + $0x38] sm:$0xff] %v2618_v27   ;;  %v1622_v0 = vmul.f32 0.5, %v2941_v46  ;;  %2942 = vtanh.f32 %v1495_v35 }
 0x3a5   : > { %v1685_v32 = vadd.f32 0.5, %v1621_v4  ;;  %2944 = vtanh.f32 %v1496_v31 }
 0x3a6   : > { %v1686_v58 = vadd.f32 0.5, %v1622_v0 }
 0x3a7   : > { %v1749_v15 = vmul.f32 %v1685_v32, %v1337_v23  ;;  %v1341_v22 = vpop.f32.mrf.mxu0  ;;  %v1430_v50 = vpop.f32.mrf.mxu1  ;;  %v4840_v23 = vld [vmem:[#allocation26_spill] sm:$0xff] }
 0x3a8   : > { %v1750_v30 = vmul.f32 %v1686_v58, %v1426_v13  ;;  %v1342_v42 = vadd.f32 %v1341_v22, %v3752_v36  ;;  %v1431_v20 = vadd.f32 %v1430_v50, %v3754_v60  ;;  %v4842_v50 = vld [vmem:[#allocation30_spill] sm:$0xff] }
 0x3a9   : > { %v1787_v18 = vpack.c.bf16 %v1749_v15, %v1747_v3 }
 0x3aa   : > { %v1976_v14 = vpop.f32.mrf.mxu2  ;;  %v1497_v16 = vmul.f32 0.5, %v1342_v42  ;;  %v1788_v6 = vpack.c.bf16 %v1750_v30, %v1748_v55  ;;  %v1498_v63 = vmul.f32 0.5, %v1431_v20  ;;  %v2943_v57 = vpop.eup %2942 }
 0x3ab   : > { %v2065_v41 = vpop.f32.mrf.mxu3  ;;  %v1977_v11 = vadd.f32 %v4572_v28, %v1976_v14  ;;  %1995 = vmatmul.bf16.gmra.mxu2 %v1787_v18  ;;  %v2945_v12 = vpop.eup %2944  ;;  %v1623_v39 = vmul.f32 0.5, %v2943_v57 }
 0x3ac   : > { %2946 = vtanh.f32 %v1497_v16  ;;  %2084 = vmatmul.bf16.gmra.mxu3 %v1788_v6  ;;  %v1624_v45 = vmul.f32 0.5, %v2945_v12 }
 0x3ad   : > { %v2066_v44 = vadd.f32 %v2065_v41, %v1977_v11  ;;  %2948 = vtanh.f32 %v1498_v63  ;;  %v1687_v47 = vadd.f32 0.5, %v1623_v39 }
 0x3ae   : > { %v1688_v17 = vadd.f32 0.5, %v1624_v45 }
 0x3af   : > { %v1344_v19 = vpop.f32.mrf.mxu0  ;;  %v1433_v7 = vpop.f32.mrf.mxu1  ;;  %v2121_v13 = vadd.f32 %v4840_v23, %v2066_v44  ;;  %v1751_v61 = vmul.f32 %v1687_v47, %v4581_v43 }
 0x3b0   : > { %v1345_v62 = vadd.f32 %v1344_v19, %v3752_v36  ;;  %v1434_v5 = vadd.f32 %v1433_v7, %v3754_v60  ;;  %v1752_v35 = vmul.f32 %v1688_v17, %v4585_v38  ;;  %v4845_v17 = vld [vmem:[#allocation31_spill] sm:$0xff] }
 0x3b2   : > { %v1978_v24 = vpop.f32.mrf.mxu2  ;;  %v2947_v40 = vpop.eup %2946  ;;  %v1499_v52 = vmul.f32 0.5, %v1345_v62  ;;  %v1500_v53 = vmul.f32 0.5, %v1434_v5 }
 0x3b3   : > { %v1979_v8 = vadd.f32 %v4572_v28, %v1978_v24  ;;  %v2067_v1 = vpop.f32.mrf.mxu3  ;;  %v2949_v21 = vpop.eup %2948  ;;  %v1625_v33 = vmul.f32 0.5, %v2947_v40 }
 0x3b4   : > { %v1626_v54 = vmul.f32 0.5, %v2949_v21  ;;  %2950 = vtanh.f32 %v1499_v52 }
 0x3b5   : > { %v2068_v26 = vadd.f32 %v2067_v1, %v1979_v8  ;;  %v1689_v56 = vadd.f32 0.5, %v1625_v33  ;;  %2952 = vtanh.f32 %v1500_v53 }
 0x3b6   : > { %v1690_v34 = vadd.f32 0.5, %v1626_v54 }
 0x3b7   : > { %v2122_v10 = vadd.f32 %v4841_v49, %v2068_v26  ;;  %v1753_v9 = vmul.f32 %v1689_v56, %v1342_v42  ;;  %v1346_v48 = vpop.f32.mrf.mxu0  ;;  %v1435_v4 = vpop.f32.mrf.mxu1 }
 0x3b8   : > { %v1754_v46 = vmul.f32 %v1690_v34, %v1431_v20  ;;  %v1347_v37 = vadd.f32 %v1346_v48, %v3752_v36  ;;  %v1436_v25 = vadd.f32 %v1435_v4, %v3754_v60  ;;  %v4843_v20 = vld [vmem:[#allocation27_spill] sm:$0xff] }
 0x3b9   : > { %v2623_v51 = vpack.c.bf16 %v2122_v10, %v2121_v13  ;;  %v1789_v0 = vpack.c.bf16 %v1753_v9, %v1751_v61 }
 0x3ba   : > { %v1981_v59 = vpop.f32.mrf.mxu2  ;;  %v1501_v14 = vmul.f32 0.5, %v1347_v37  ;;  %v1790_v32 = vpack.c.bf16 %v1754_v46, %v1752_v35  ;;  %v1502_v41 = vmul.f32 0.5, %v1436_v25  ;;  %v2951_v58 = vpop.eup %2950 }
 0x3bb   : > { %2682 = vst [vmem:[%s4275_s17 + $0x40] sm:$0xff] %v2623_v51   ;;  %v2070_v27 = vpop.f32.mrf.mxu3  ;;  %v1982_v31 = vadd.f32 %v4572_v28, %v1981_v59  ;;  %2000 = vmatmul.bf16.gmra.mxu2 %v1789_v0  ;;  %v2953_v3 = vpop.eup %2952  ;;  %v1627_v55 = vmul.f32 0.5, %v2951_v58  ;;  %v4844_v51 = vld [vmem:[#allocation29_spill] sm:$0xff] }
 0x3bc   : > { %2954 = vtanh.f32 %v1501_v14  ;;  %2089 = vmatmul.bf16.gmra.mxu3 %v1790_v32  ;;  %v1628_v42 = vmul.f32 0.5, %v2953_v3 }
 0x3bd   : > { %v2071_v15 = vadd.f32 %v2070_v27, %v1982_v31  ;;  %2956 = vtanh.f32 %v1502_v41  ;;  %v1691_v63 = vadd.f32 0.5, %v1627_v55 }
 0x3be   : > { %v1692_v12 = vadd.f32 0.5, %v1628_v42 }
 0x3bf   : > { %v2123_v11 = vadd.f32 %v4842_v50, %v2071_v15  ;;  %v1755_v19 = vmul.f32 %v1691_v63, %v1345_v62 }
 0x3c0   : > { %v1756_v7 = vmul.f32 %v1692_v12, %v1434_v5  ;;  %v4846_v12 = vld [vmem:[#allocation32_spill] sm:$0xff] }
 0x3c2   : > { %v1983_v43 = vpop.f32.mrf.mxu2  ;;  %v2955_v16 = vpop.eup %2954 }
 0x3c3   : > { %v1984_v38 = vadd.f32 %v4572_v28, %v1983_v43  ;;  %v2072_v22 = vpop.f32.mrf.mxu3  ;;  %v2957_v6 = vpop.eup %2956  ;;  %v1629_v57 = vmul.f32 0.5, %v2955_v16 }
 0x3c4   : > { %v1630_v44 = vmul.f32 0.5, %v2957_v6 }
 0x3c5   : > { %v2073_v30 = vadd.f32 %v2072_v22, %v1984_v38  ;;  %v1693_v1 = vadd.f32 0.5, %v1629_v57 }
 0x3c6   : > { %v1694_v26 = vadd.f32 0.5, %v1630_v44 }
 0x3c7   : > { %v2124_v18 = vadd.f32 %v4843_v20, %v2073_v30  ;;  %v1757_v45 = vmul.f32 %v1693_v1, %v1347_v37 }
 0x3c8   : > { %v1758_v23 = vmul.f32 %v1694_v26, %v1436_v25 }
 0x3c9   : > { %v2628_v24 = vpack.c.bf16 %v2124_v18, %v2123_v11  ;;  %v1791_v49 = vpack.c.bf16 %v1757_v45, %v1755_v19 }
 0x3ca   : > { %v1986_v8 = vpop.f32.mrf.mxu2  ;;  %v1792_v10 = vpack.c.bf16 %v1758_v23, %v1756_v7 }
 0x3cb   : > { %2683 = vst [vmem:[%s4275_s17 + $0x48] sm:$0xff] %v2628_v24   ;;  %v2075_v39 = vpop.f32.mrf.mxu3  ;;  %v1987_v13 = vadd.f32 %v4572_v28, %v1986_v8  ;;  %2005 = vmatmul.bf16.gmra.mxu2 %v1791_v49  ;;  %v4847_v8 = vld [vmem:[#allocation33_spill] sm:$0xff] }
 0x3cc   : > { %2094 = vmatmul.bf16.gmra.mxu3 %v1792_v10 }
 0x3cd   : > { %v2076_v52 = vadd.f32 %v2075_v39, %v1987_v13 }
 0x3cf   : > { %v2125_v53 = vadd.f32 %v4844_v51, %v2076_v52 }
 0x3d2   : > { %v1988_v40 = vpop.f32.mrf.mxu2 }
 0x3d3   : > { %v1989_v21 = vadd.f32 %v4572_v28, %v1988_v40  ;;  %v2077_v47 = vpop.f32.mrf.mxu3  ;;  %v4848_v40 = vld [vmem:[#allocation34_spill] sm:$0xff] }
 0x3d5   : > { %v2078_v33 = vadd.f32 %v2077_v47, %v1989_v21  ;;  %v4849_v21 = vld [vmem:[#allocation35_spill] sm:$0xff] }
 0x3d7   : > { %v2126_v62 = vadd.f32 %v4845_v17, %v2078_v33 }
 0x3d9   : > { %v2633_v54 = vpack.c.bf16 %v2126_v62, %v2125_v53 }
 0x3db   : > { %2684 = vst [vmem:[%s4275_s17 + $0x50] sm:$0xff] %v2633_v54  }
 0x408   : > { %v1349_v5 = vpop.f32.mrf.mxu0  ;;  %v1438_v59 = vpop.f32.mrf.mxu1 }
 0x409   : > { %v1350_v56 = vadd.f32 %v1349_v5, %v3752_v36  ;;  %v1439_v27 = vadd.f32 %v1438_v59, %v3754_v60 }
 0x40b   : > { %v1503_v34 = vmul.f32 0.5, %v1350_v56  ;;  %v1504_v61 = vmul.f32 0.5, %v1439_v27 }
 0x40d   : > { %2958 = vtanh.f32 %v1503_v34 }
 0x40e   : > { %2960 = vtanh.f32 %v1504_v61  ;;  %v4851_v61 = vld [vmem:[#allocation36_spill] sm:$0xff] }
 0x410   : > { %v1351_v9 = vpop.f32.mrf.mxu0  ;;  %v1440_v48 = vpop.f32.mrf.mxu1 }
 0x411   : > { %v1352_v35 = vadd.f32 %v1351_v9, %v3752_v36  ;;  %v1441_v46 = vadd.f32 %v1440_v48, %v3754_v60 }
 0x413   : > { %v1505_v37 = vmul.f32 0.5, %v1352_v35  ;;  %v1506_v4 = vmul.f32 0.5, %v1441_v46  ;;  %v2959_v31 = vpop.eup %2958 }
 0x414   : > { %v2961_v25 = vpop.eup %2960  ;;  %v1631_v0 = vmul.f32 0.5, %v2959_v31 }
 0x415   : > { %2962 = vtanh.f32 %v1505_v37  ;;  %v1632_v14 = vmul.f32 0.5, %v2961_v25 }
 0x416   : > { %2964 = vtanh.f32 %v1506_v4  ;;  %v1695_v58 = vadd.f32 0.5, %v1631_v0 }
 0x417   : > { %v1696_v3 = vadd.f32 0.5, %v1632_v14 }
 0x418   : > { %v1759_v30 = vmul.f32 %v1695_v58, %v1350_v56  ;;  %v4853_v58 = vld [vmem:[#allocation39_spill] sm:$0xff] }
 0x419   : > { %v1760_v42 = vmul.f32 %v1696_v3, %v1439_v27  ;;  %v4850_v27 = vld [vmem:[#allocation37_spill] sm:$0xff] }
 0x41b   : > { %v2963_v32 = vpop.eup %2962 }
 0x41c   : > { %v2965_v41 = vpop.eup %2964  ;;  %v1633_v43 = vmul.f32 0.5, %v2963_v32  ;;  %v4852_v32 = vld [vmem:[#allocation38_spill] sm:$0xff] }
 0x41d   : > { %v1634_v15 = vmul.f32 0.5, %v2965_v41  ;;  %v1991_v38 = vpop.f32.mrf.mxu2 }
 0x41e   : > { %v1697_v22 = vadd.f32 0.5, %v1633_v43  ;;  %v2080_v55 = vpop.f32.mrf.mxu3  ;;  %v1992_v11 = vadd.f32 %v4572_v28, %v1991_v38 }
 0x41f   : > { %v1698_v36 = vadd.f32 0.5, %v1634_v15 }
 0x420   : > { %v1761_v60 = vmul.f32 %v1697_v22, %v1352_v35  ;;  %v2081_v6 = vadd.f32 %v2080_v55, %v1992_v11 }
 0x421   : > { %v1762_v50 = vmul.f32 %v1698_v36, %v1441_v46 }
 0x422   : > { %v1793_v20 = vpack.c.bf16 %v1761_v60, %v1759_v30  ;;  %v2127_v44 = vadd.f32 %v4846_v12, %v2081_v6 }
 0x423   : > { %v1794_v18 = vpack.c.bf16 %v1762_v50, %v1760_v42 }
 0x424   : > { %2010 = vmatmul.bf16.gmra.mxu2 %v1793_v20 }
 0x425   : > { %2099 = vmatmul.bf16.gmra.mxu3 %v1794_v18  ;;  %v1993_v16 = vpop.f32.mrf.mxu2 }
 0x426   : > { %v1994_v63 = vadd.f32 %v4572_v28, %v1993_v16  ;;  %v2082_v57 = vpop.f32.mrf.mxu3 }
 0x428   : > { %v2083_v24 = vadd.f32 %v2082_v57, %v1994_v63 }
 0x42a   : > { %v2128_v1 = vadd.f32 %v4847_v8, %v2083_v24 }
 0x42c   : > { %v2638_v39 = vpack.c.bf16 %v2128_v1, %v2127_v44 }
 0x42e   : > { %2685 = vst [vmem:[%s4275_s17 + $0x58] sm:$0xff] %v2638_v39   ;;  %v1996_v26 = vpop.f32.mrf.mxu2 }
 0x42f   : > { %v2085_v19 = vpop.f32.mrf.mxu3  ;;  %v1997_v45 = vadd.f32 %v4572_v28, %v1996_v26 }
 0x431   : > { %v2086_v23 = vadd.f32 %v2085_v19, %v1997_v45 }
 0x433   : > { %v2129_v52 = vadd.f32 %v4848_v40, %v2086_v23 }
 0x436   : > { %v1998_v7 = vpop.f32.mrf.mxu2 }
 0x437   : > { %v1999_v13 = vadd.f32 %v4572_v28, %v1998_v7  ;;  %v2087_v49 = vpop.f32.mrf.mxu3 }
 0x439   : > { %v2088_v10 = vadd.f32 %v2087_v49, %v1999_v13 }
 0x43b   : > { %v2130_v47 = vadd.f32 %v4849_v21, %v2088_v10 }
 0x43d   : > { %v2643_v33 = vpack.c.bf16 %v2130_v47, %v2129_v52 }
 0x43e   : > { %v2001_v51 = vpop.f32.mrf.mxu2 }
 0x43f   : > { %2686 = vst [vmem:[%s4275_s17 + $0x60] sm:$0xff] %v2643_v33   ;;  %v2090_v53 = vpop.f32.mrf.mxu3  ;;  %v2002_v17 = vadd.f32 %v4572_v28, %v2001_v51 }
 0x441   : > { %v2091_v54 = vadd.f32 %v2090_v53, %v2002_v17 }
 0x443   : > { %v2131_v34 = vadd.f32 %v4850_v27, %v2091_v54 }
 0x446   : > { %v2003_v62 = vpop.f32.mrf.mxu2 }
 0x447   : > { %v2004_v5 = vadd.f32 %v4572_v28, %v2003_v62  ;;  %v2092_v59 = vpop.f32.mrf.mxu3 }
 0x449   : > { %v2093_v56 = vadd.f32 %v2092_v59, %v2004_v5 }
 0x44b   : > { %v2132_v9 = vadd.f32 %v4851_v61, %v2093_v56 }
 0x44d   : > { %v2648_v48 = vpack.c.bf16 %v2132_v9, %v2131_v34 }
 0x44e   : > { %v2006_v35 = vpop.f32.mrf.mxu2 }
 0x44f   : > { %2687 = vst [vmem:[%s4275_s17 + $0x68] sm:$0xff] %v2648_v48   ;;  %v2095_v46 = vpop.f32.mrf.mxu3  ;;  %v2007_v37 = vadd.f32 %v4572_v28, %v2006_v35 }
 0x451   : > { %v2096_v31 = vadd.f32 %v2095_v46, %v2007_v37 }
 0x453   : > { %v2133_v41 = vadd.f32 %v4852_v32, %v2096_v31 }
 0x456   : > { %v2008_v4 = vpop.f32.mrf.mxu2 }
 0x457   : > { %v2009_v25 = vadd.f32 %v4572_v28, %v2008_v4  ;;  %v2097_v0 = vpop.f32.mrf.mxu3 }
 0x459   : > { %v2098_v14 = vadd.f32 %v2097_v0, %v2009_v25 }
 0x45b   : > { %v2134_v43 = vadd.f32 %v4853_v58, %v2098_v14 }
 0x45d   : > { %v2653_v3 = vpack.c.bf16 %v2134_v43, %v2133_v41 }
 0x45f   : > { %2688 = vst [vmem:[%s4275_s17 + $0x70] sm:$0xff] %v2653_v3  }
 0x4a7   : > { %v2011_v15 = vpop.f32.mrf.mxu2 }
 0x4a8   : > { %v2100_v38 = vpop.f32.mrf.mxu3  ;;  %v2012_v22 = vadd.f32 %v4572_v28, %v2011_v15 }
 0x4aa   : > { %v2101_v36 = vadd.f32 %v2100_v38, %v2012_v22 }
 0x4ac   : > { %v2135_v50 = vadd.f32 %v3967_v29, %v2101_v36 }
 0x4af   : > { %v2013_v55 = vpop.f32.mrf.mxu2 }
 0x4b0   : > { %v2014_v30 = vadd.f32 %v4572_v28, %v2013_v55  ;;  %v2102_v60 = vpop.f32.mrf.mxu3 }
 0x4b2   : > { %v2103_v42 = vadd.f32 %v2102_v60, %v2014_v30 }
 0x4b4   : > { %v2136_v11 = vadd.f32 %v4062_v2, %v2103_v42  ;;  %2208 = sbr.rel (!%p3293_p11) target bundleno = 1240 (0x4d8), region = 68 }
 0x4b6   : > { %v2658_v20 = vpack.c.bf16 %v2136_v11, %v2135_v50 }
 0x4b8   : > { %2689 = vst [vmem:[%s4275_s17 + $0x78] sm:$0xff] %v2658_v20  }
 0x4b9   : > { %s4864_s11 = smov (!%p2211_p6, %s2210_s11), 32 }
 0x4ba   : > { %s2475_s16 = sshll.u32 %s4864_s11, 2 }
 0x4bb   : > { %s2214_s12 = ssub.s32 128, %s2475_s16 }
 0x4bc   : > { %s2215_s15 = sshll.u32 %s2214_s12, 4 }
 0x4bd   : > { %2216 = vsyncadd %s2202_s1, %s2215_s15  ;;  %p4650_p9 = scmp.ne.s32.totalorder %s2475_s16, 0  ;;  %s2515_s23 = sshll.u32 %s3262_s28, 7 }
 0x4be   : > { %s2219_s21 = scalar_lea.hbm %s4710_s7, %s2515_s23  ;;  %s2221_s22 = sshll.u32 %s4275_s17, 4  ;;  %s4659_s22 = int_to_ptr.vmem [resolvable:$true] %s2221_s22 }
 0x4bf   : > { %s2223_s18 = sshll.u32 %s2219_s21, 4  ;;  %s2479_s19 = sshll.u32 %s4864_s11, 6  ;;  %s4661_s18 = int_to_ptr.hbm [resolvable:$true] %s2223_s18 }
 0x4c0   : > { %s3100_s9 = sshra.s32 %s4659_s22, 4  ;;  %s3102_s29 = sshrl.u32 %s2479_s19, 4  ;;  %s3101_s9 = int_to_ptr.vmem [resolvable:$true] %s3100_s9 }
 0x4c1   : > { %s3107_s20 = scalar_lea.vmem %s3101_s9, %s3102_s29  ;;  %s3198_s28 = smov [#allocation10]  }
 0x4c2   : > { %p3108_p11 = scmp.ne.s32.totalorder %s3101_s9, %s3107_s20  ;;  %s3111_s30 = scalar_lea.vmem %s3198_s28, 256 }
 0x4c3   : > { %p3113_p0 = scmp.lt.s32.totalorder %s3111_s30, %s3107_s20 }
 0x4c4   : > { %p3109_p10 = pnand %p3108_p11, %p4650_p9 }
 0x4c6   : > { %p3110_p1 = pneg %p3109_p10 }
 0x4c8   : > { %p3115_p2 = pnand %p3113_p0, %p3110_p1 }
 0x4ca   : > { %3118 = shalt.err (!%p3115_p2)
}
 0x4cb   : > { %s3119_s17 = sshra.s32 %s4661_s18, 4  ;;  %s3130_s23 = scalar_lea.hbm %s4710_s7, 360  ;;  %s3120_s17 = int_to_ptr.hbm [resolvable:$true] %s3119_s17 }
 0x4cc   : > { %s3126_s16 = scalar_lea.hbm %s3120_s17, %s3102_s29  ;;  %p3131_p4 = scmp.lt.s32.totalorder %s3120_s17, %s4710_s7 }
 0x4cd   : > { %p3127_p3 = scmp.ne.s32.totalorder %s3120_s17, %s3126_s16  ;;  %p3132_p12 = scmp.lt.s32.totalorder %s3130_s23, %s3126_s16 }
 0x4cf   : > { %p3128_p7 = pnand %p3127_p3, %p4650_p9  ;;  %p3133_p13 = por %p3132_p12, %p3131_p4 }
 0x4d1   : > { %p3129_p8 = pneg %p3128_p7 }
 0x4d3   : > { %p3134_p5 = pnand %p3133_p13, %p3129_p8 }
 0x4d5   : > { %3137 = shalt.err (!%p3134_p5)
}
 0x4d6   : > { %s3199_s21 = smov 64   ;;  %s3200_s9 = smov 4  }
 0x4d7   : > { %2229 = dma.vmem_to_hbm [thread:$0]  (%p4650_p9), %s4659_s22, %s2479_s19, %s4661_s18, %s2202_s1, %s3199_s21, %s3199_s21, %s3200_s9  }
 0x4d8 PF: > { %p2724_p6 = scmp.ge.s32.totalorder %s3185_s27, 2  ;;  %s2238_s29 = sand.u32 1, %s3173_s24  }
 0x4d9   : > { %p4855_p11 = scmp.ne.s32.totalorder %s4746_s14, 0  ;;  %s2239_s20 = scalar_lea.sflag [#allocation4], %s2238_s29 }
 0x4db   : > { %p2715_p10 = pnand %p2724_p6, %p4855_p11 }
 0x4dd   : > { %p2716_p1 = pneg %p2715_p10 }
 0x4df   : > { %3168 = dma.done.wait (%p2716_p1), %s2239_s20, 2048  }
 0x4e0   : > { %3170 = vsyncadd (%p2716_p1), %s2239_s20, 4294965248  ;;  %s4856_s27 = sld [smem:[#allocation15_spill]]  ;;  %s4858_s24 = smov %s3177_s25 }
 0x4e1   : > { %s4857_s13 = sld [smem:[#allocation16_spill]]  ;;  %s4859_s25 = smov %s3181_s26 }
 0x4e6   : > { %p22_p0 = scmp.ge.s32.totalorder %s4856_s27, 5  }
 0x4e7   : > { %s4860_s26 = smov %s4857_s13 }
 0x4e8   :  { %24 = sbr.rel (!%p22_p0) target bundleno = 10 (0xa), region = 105 }
 0x4ed   :  { %2245 = vsyncpa [#allocation3], 1 }
 0x4ee   :  { %2247 = vsyncpa [#allocation3 + $0x1], 1 }
 0x4ef   :  { %2248 = vsyncpa [#allocation6], 1 }
 0x4f0   :  { %2249 = vsyncpa [#allocation9], 1 }
 0x4f1   :  { %2250 = vsyncpa [#allocation4], 1 }
 0x4f2   :  { %2252 = vsyncpa [#allocation4 + $0x1], 1 }

</bundles_post_ra>
